<compile_context>
chip_gen: v7x
topology: tpu7x:2x2x1
jax: 0.10.0
libtpu: 0.0.40
codegen_flags: <defaults>
</compile_context>

<pallas_src>
import functools
import math

import jax
import jax.numpy as jnp
from jax.experimental import pallas as pl
from jax.experimental.pallas import tpu as pltpu


def _layer_norm(x, a, b, eps=1e-6):
    # torch (custom LayerNorm in the spec): a_2 * (x - mean) / (std + eps) + b_2,
    # std is the UNBIASED (N-1) estimator, eps added OUTSIDE the sqrt.
    mean = jnp.mean(x, axis=-1, keepdims=True)
    var = jnp.sum((x - mean) ** 2, axis=-1, keepdims=True) / (x.shape[-1] - 1)
    inv = pl.reciprocal(jnp.sqrt(var) + eps, approx=True)   # EUP slot, not a VALU divide
    return (x - mean) * (a * inv) + b


def net_tracking_kernel(H, x_ref, bias_ref, emb_w_ref, emb_b_ref, pe_ref,
                        wq_ref, bq_ref, wk_ref, bk_ref, wv_ref, bv_ref,
                        wm_ref, bm_ref, ln1a_ref, ln1b_ref,
                        w1_ref, b1_ref, w2_ref, b2_ref,
                        ln2a_ref, ln2b_ref, out_ref):
    BB = bias_ref.shape[0]            # batch rows handled by this grid step
    S = bias_ref.shape[2]             # sequence (num patches)
    N = BB * S                        # folded (batch*seq) rows
    D = emb_w_ref.shape[1]            # hidden size
    dk = D // H                       # head dim

    x = x_ref[...]                    # (N, P2), batch folded into matmul rows

    # --- LinearEmbedding: Linear(P2->D) * sqrt(D), then PositionalEncoding ---
    h2 = (jnp.dot(x, emb_w_ref[...], preferred_element_type=jnp.float32)
          + emb_b_ref[...]) * math.sqrt(float(D))                        # (N, D)
    h2 = (h2.reshape(BB, S, D) + pe_ref[...][None, :, :]).reshape(N, D)

    # --- MultiHeadAttention of the only live (last) encoder layer ---
    # Fused full-width projections (32-lane-dense outputs, K=D contractions).
    # 1/sqrt(dk) is pre-folded into wq/bq in the wrapper.
    q = jnp.dot(h2, wq_ref[...], preferred_element_type=jnp.float32) + bq_ref[...]
    k = jnp.dot(h2, wk_ref[...], preferred_element_type=jnp.float32) + bk_ref[...]
    v = jnp.dot(h2, wv_ref[...], preferred_element_type=jnp.float32) + bv_ref[...]

    # (N, D) -> (BB*H, S, dk): merge batch & heads into ONE einsum batch dim
    # (single-batch-dim dot_general lowers cleanly on Mosaic).
    def to_heads(t):
        t4 = jnp.transpose(t.reshape(BB, S, H, dk), (0, 2, 1, 3))        # (BB,H,S,dk)
        return t4.reshape(BB * H, S, dk)

    q3, k3, v3 = to_heads(q), to_heads(k), to_heads(v)

    # Additive key-padding bias (-1e9 on masked keys), broadcast once over heads.
    bias = jnp.broadcast_to(bias_ref[...][:, None, :, :],
                            (BB, H, 1, S)).reshape(BB * H, 1, S)

    # scores = (q/sqrt(dk)) @ k^T + mask_bias, one batched einsum for all heads
    sc = jnp.einsum('nqd,nkd->nqk', q3, k3,
                    preferred_element_type=jnp.float32) + bias           # (BB*H,S,S)
    sc = sc - jnp.max(sc, axis=-1, keepdims=True)
    e = jnp.exp(sc)
    p = e * pl.reciprocal(jnp.sum(e, axis=-1, keepdims=True), approx=True)
    av = jnp.einsum('nqk,nkd->nqd', p, v3,
                    preferred_element_type=jnp.float32)                  # (BB*H,S,dk)

    # Back to (N, D) with heads contiguous along lanes (PyTorch concat order),
    # then ONE lane-dense K=D merge matmul against the un-split linear_merge.
    av = jnp.transpose(av.reshape(BB, H, S, dk), (0, 2, 1, 3)).reshape(N, D)
    atted = jnp.dot(av, wm_ref[...], preferred_element_type=jnp.float32) + bm_ref[...]

    # residual + LayerNorm 1  (dropout1 == identity)
    y1 = _layer_norm(h2 + atted, ln1a_ref[...], ln1b_ref[...])

    # FFN: Linear(D->F) -> ReLU -> Linear(F->D)
    ff = jnp.maximum(
        jnp.dot(y1, w1_ref[...], preferred_element_type=jnp.float32) + b1_ref[...], 0.0)
    ff = jnp.dot(ff, w2_ref[...], preferred_element_type=jnp.float32) + b2_ref[...]

    # residual + LayerNorm 2  (dropout2 == identity)
    y = _layer_norm(y1 + ff, ln2a_ref[...], ln2b_ref[...])

    # torch.max over dim=1 (sequence), per batch row.  Final Linear(D->O) runs
    # in the wrapper so the kernel's stored output stays lane-dense (D lanes).
    out_ref[...] = jnp.max(y.reshape(BB, S, D), axis=1)


def positional_encoding(max_len, d_model):
    position = jnp.arange(max_len, dtype=jnp.float32)[:, None]
    div_term = jnp.exp(jnp.arange(0, d_model, 2, dtype=jnp.float32)
                       * (-math.log(10000.0) / d_model))
    pe = jnp.zeros((max_len, d_model), jnp.float32)
    pe = pe.at[:, 0::2].set(jnp.sin(position * div_term))
    pe = pe.at[:, 1::2].set(jnp.cos(position * div_term))
    return pe


def init_params(key, P2, D, F, O, L, S):
    ks = jax.random.split(key, 10)
    w = lambda k, shape: 0.02 * jax.random.normal(k, shape, jnp.float32)
    params = {
        "emb_w": w(ks[0], (P2, D)),
        "emb_b": jnp.zeros((1, D), jnp.float32),
        "pe": positional_encoding(S + 1, D)[:S, :],     # pe[:, :x.shape[1], :]
        "wq": w(ks[1], (L, D, D)), "bq": jnp.zeros((L, D), jnp.float32),
        "wk": w(ks[2], (L, D, D)), "bk": jnp.zeros((L, D), jnp.float32),
        "wv": w(ks[3], (L, D, D)), "bv": jnp.zeros((L, D), jnp.float32),
        "wm": w(ks[4], (L, D, D)), "bm": jnp.zeros((L, D), jnp.float32),
        "ln1a": jnp.ones((L, D), jnp.float32), "ln1b": jnp.zeros((L, D), jnp.float32),
        "w1": w(ks[5], (L, D, F)), "b1": jnp.zeros((L, F), jnp.float32),
        "w2": w(ks[6], (L, F, D)), "b2": jnp.zeros((L, D), jnp.float32),
        "ln2a": jnp.ones((L, D), jnp.float32), "ln2b": jnp.zeros((L, D), jnp.float32),
        "final_w": w(ks[7], (D, O)),
        "final_b": jnp.zeros((1, O), jnp.float32),
    }
    return params


def net_tracking_forward(x, x_mask, params, n_heads, batch_block=None):
    B, S, P2 = x.shape
    D = params["emb_w"].shape[1]
    L = params["wq"].shape[0]
    H = n_heads
    dk = D // H

    # Whole batch in one grid step by default (best on single-TC v5e/v6e and —
    # per the perf review — also on v7x at these tiny shapes).  Only split
    # (batch_block=B//2, multiple of 8) once per-core rows BB*S reach ~256.
    BB = B if batch_block is None else batch_block
    assert B % BB == 0
    assert BB == B or BB % 8 == 0, "partial batch blocks must be sublane-aligned"
    n_blocks = B // BB
    N = BB * S

    # Only the LAST encoder layer contributes to the output: the PyTorch loop
    # `for enc in self.enc: y = enc(x, x_mask)` never feeds y back into x, so
    # layers 0..L-2 are dead code and skipping them is output-identical.
    l = L - 1
    inv_sqrt_dk = 1.0 / math.sqrt(float(dk))
    wq = params["wq"][l] * inv_sqrt_dk                 # fold score scale into Q
    bq = (params["bq"][l] * inv_sqrt_dk).reshape(1, D)
    wk = params["wk"][l]
    bk = params["bk"][l].reshape(1, D)
    wv = params["wv"][l]
    bv = params["bv"][l].reshape(1, D)
    wm = params["wm"][l]                               # un-split merge weight
    bm = params["bm"][l].reshape(1, D)
    ln1a = params["ln1a"][l].reshape(1, D)
    ln1b = params["ln1b"][l].reshape(1, D)
    w1 = params["w1"][l]
    b1 = params["b1"][l].reshape(1, -1)
    w2 = params["w2"][l]
    b2 = params["b2"][l].reshape(1, D)
    ln2a = params["ln2a"][l].reshape(1, D)
    ln2b = params["ln2b"][l].reshape(1, D)
    emb_w = params["emb_w"]
    emb_b = params["emb_b"].reshape(1, D)
    pe = params["pe"]                                  # (S, D) — no tiling

    # masked_fill(mask==0, -1e9) as a precomputed additive bias.
    att_bias = jnp.where(x_mask == 0.0, -1e9, 0.0).astype(jnp.float32)   # (B,1,S)

    x_flat = x.reshape(B * S, P2)     # fold batch into matmul rows (free reshape)

    weights = [emb_w, emb_b, pe,
               wq, bq, wk, bk, wv, bv, wm, bm,
               ln1a, ln1b, w1, b1, w2, b2, ln2a, ln2b]

    def const_spec(a):
        nd = a.ndim
        return pl.BlockSpec(a.shape, lambda i, _n=nd: (0,) * _n)

    in_specs = [
        pl.BlockSpec((N, P2), lambda i: (i, 0)),        # x rows of this batch block
        pl.BlockSpec((BB, 1, S), lambda i: (i, 0, 0)),  # additive key-padding bias
    ] + [const_spec(a) for a in weights]
    out_spec = pl.BlockSpec((BB, D), lambda i: (i, 0))

    pooled = pl.pallas_call(
        functools.partial(net_tracking_kernel, H),
        out_shape=jax.ShapeDtypeStruct((B, D), jnp.float32),
        grid_spec=pltpu.PrefetchScalarGridSpec(
            num_scalar_prefetch=0,
            grid=(n_blocks,),
            in_specs=in_specs,
            out_specs=out_spec,
        ),
        compiler_params=pltpu.CompilerParams(
            dimension_semantics=("parallel",)),
    )(x_flat, att_bias, *weights)

    # Final Linear(D -> O): O=4 lanes is too sparse for a kernel store; the
    # (B, D) @ (D, O) matmul is trivial and cheaper left to XLA.
    return pooled @ params["final_w"] + params["final_b"]


if __name__ == "__main__":
    key = jax.random.PRNGKey(0)
    # cfg-implied small shapes:
    B = 2                 # batch_size
    patch = 4             # patch_size
    img_h, img_w = 16, 8  # height, width  -> patches_sequence = 4*2 = 8
    D = 32                # embedding_size
    F = 64                # neuron (FFN size)
    heads = 4             # mha
    L = 2                 # layer
    O = 4                 # output_dimension
    P2 = patch * patch
    S = (img_h // patch) * (img_w // patch)

    kx, kp = jax.random.split(key)
    x = jax.random.normal(kx, (B, S, P2), jnp.float32)
    # key-padding mask: keep everything for batch 0, mask last 2 keys for batch 1
    x_mask = jnp.ones((B, 1, S), jnp.float32).at[1, 0, -2:].set(0.0)

    params = init_params(kp, P2, D, F, O, L, S)

    out = net_tracking_forward(x, x_mask, params, heads)
    out = jax.block_until_ready(out)
    assert out.shape == (B, O) and jnp.all(jnp.isfinite(out))
    print("KERNEL_OK")
</pallas_src>

<mosaic_0001>
module attributes {stable_mosaic.version = 11 : i64} {
  func.func @net_tracking_kernel(%arg0: i32, %arg1: memref<16x16xf32, #tpu.memory_space<vmem>>, %arg2: memref<2x1x8xf32, #tpu.memory_space<vmem>>, %arg3: memref<16x32xf32, #tpu.memory_space<vmem>>, %arg4: memref<1x32xf32, #tpu.memory_space<vmem>>, %arg5: memref<8x32xf32, #tpu.memory_space<vmem>>, %arg6: memref<32x32xf32, #tpu.memory_space<vmem>>, %arg7: memref<1x32xf32, #tpu.memory_space<vmem>>, %arg8: memref<32x32xf32, #tpu.memory_space<vmem>>, %arg9: memref<1x32xf32, #tpu.memory_space<vmem>>, %arg10: memref<32x32xf32, #tpu.memory_space<vmem>>, %arg11: memref<1x32xf32, #tpu.memory_space<vmem>>, %arg12: memref<32x32xf32, #tpu.memory_space<vmem>>, %arg13: memref<1x32xf32, #tpu.memory_space<vmem>>, %arg14: memref<1x32xf32, #tpu.memory_space<vmem>>, %arg15: memref<1x32xf32, #tpu.memory_space<vmem>>, %arg16: memref<32x64xf32, #tpu.memory_space<vmem>>, %arg17: memref<1x64xf32, #tpu.memory_space<vmem>>, %arg18: memref<64x32xf32, #tpu.memory_space<vmem>>, %arg19: memref<1x32xf32, #tpu.memory_space<vmem>>, %arg20: memref<1x32xf32, #tpu.memory_space<vmem>>, %arg21: memref<1x32xf32, #tpu.memory_space<vmem>>, %arg22: memref<2x32xf32, #tpu.memory_space<vmem>>) attributes {dimension_semantics = [#tpu.dimension_semantics<parallel>], iteration_bounds = array<i64: 1>, scalar_prefetch = 0 : i64, scratch_operands = 0 : i64, tpu.core_type = #tpu.core_type<tc>, window_params = [{transform_indices = @transform_0, window_bounds = array<i64: 16, 16>}, {transform_indices = @transform_1, window_bounds = array<i64: 2, 1, 8>}, {pipeline_mode = #tpu.pipeline_mode<synchronous>, transform_indices = @transform_2, window_bounds = array<i64: 16, 32>}, {pipeline_mode = #tpu.pipeline_mode<synchronous>, transform_indices = @transform_3, window_bounds = array<i64: 1, 32>}, {pipeline_mode = #tpu.pipeline_mode<synchronous>, transform_indices = @transform_4, window_bounds = array<i64: 8, 32>}, {pipeline_mode = #tpu.pipeline_mode<synchronous>, transform_indices = @transform_5, window_bounds = array<i64: 32, 32>}, {pipeline_mode = #tpu.pipeline_mode<synchronous>, transform_indices = @transform_6, window_bounds = array<i64: 1, 32>}, {pipeline_mode = #tpu.pipeline_mode<synchronous>, transform_indices = @transform_7, window_bounds = array<i64: 32, 32>}, {pipeline_mode = #tpu.pipeline_mode<synchronous>, transform_indices = @transform_8, window_bounds = array<i64: 1, 32>}, {pipeline_mode = #tpu.pipeline_mode<synchronous>, transform_indices = @transform_9, window_bounds = array<i64: 32, 32>}, {pipeline_mode = #tpu.pipeline_mode<synchronous>, transform_indices = @transform_10, window_bounds = array<i64: 1, 32>}, {pipeline_mode = #tpu.pipeline_mode<synchronous>, transform_indices = @transform_11, window_bounds = array<i64: 32, 32>}, {pipeline_mode = #tpu.pipeline_mode<synchronous>, transform_indices = @transform_12, window_bounds = array<i64: 1, 32>}, {pipeline_mode = #tpu.pipeline_mode<synchronous>, transform_indices = @transform_13, window_bounds = array<i64: 1, 32>}, {pipeline_mode = #tpu.pipeline_mode<synchronous>, transform_indices = @transform_14, window_bounds = array<i64: 1, 32>}, {pipeline_mode = #tpu.pipeline_mode<synchronous>, transform_indices = @transform_15, window_bounds = array<i64: 32, 64>}, {pipeline_mode = #tpu.pipeline_mode<synchronous>, transform_indices = @transform_16, window_bounds = array<i64: 1, 64>}, {pipeline_mode = #tpu.pipeline_mode<synchronous>, transform_indices = @transform_17, window_bounds = array<i64: 64, 32>}, {pipeline_mode = #tpu.pipeline_mode<synchronous>, transform_indices = @transform_18, window_bounds = array<i64: 1, 32>}, {pipeline_mode = #tpu.pipeline_mode<synchronous>, transform_indices = @transform_19, window_bounds = array<i64: 1, 32>}, {pipeline_mode = #tpu.pipeline_mode<synchronous>, transform_indices = @transform_20, window_bounds = array<i64: 1, 32>}, {transform_indices = @transform_21, window_bounds = array<i64: 2, 32>}]} {
    %c0 = arith.constant 0 : index
    %c0_0 = arith.constant 0 : index
    %0 = vector.load %arg1[%c0, %c0_0] : memref<16x16xf32, #tpu.memory_space<vmem>>, vector<16x16xf32>
    %c0_1 = arith.constant 0 : index
    %c0_2 = arith.constant 0 : index
    %1 = vector.load %arg3[%c0_1, %c0_2] : memref<16x32xf32, #tpu.memory_space<vmem>>, vector<16x32xf32>
    %cst = arith.constant dense<0.000000e+00> : vector<16x32xf32>
    %2 = tpu.matmul %0, %1, %cst {dimension_numbers = #tpu.dot_dimension_numbers<[1], [0], [0], [1], [0, 0, 1, 1], [], []>} : vector<16x16xf32>, vector<16x32xf32>, vector<16x32xf32> -> vector<16x32xf32>
    %c0_3 = arith.constant 0 : index
    %c0_4 = arith.constant 0 : index
    %3 = vector.load %arg4[%c0_3, %c0_4] : memref<1x32xf32, #tpu.memory_space<vmem>>, vector<1x32xf32>
    %4 = vector.broadcast %3 : vector<1x32xf32> to vector<16x32xf32>
    %5 = arith.addf %2, %4 : vector<16x32xf32>
    %cst_5 = arith.constant 5.65685415 : f32
    %6 = vector.broadcast %cst_5 : f32 to vector<16x32xf32>
    %7 = arith.mulf %5, %6 : vector<16x32xf32>
    %8 = vector.shape_cast %7 : vector<16x32xf32> to vector<2x8x32xf32>
    %c0_6 = arith.constant 0 : index
    %c0_7 = arith.constant 0 : index
    %9 = vector.load %arg5[%c0_6, %c0_7] : memref<8x32xf32, #tpu.memory_space<vmem>>, vector<8x32xf32>
    %10 = vector.shape_cast %9 : vector<8x32xf32> to vector<1x8x32xf32>
    %11 = vector.broadcast %10 : vector<1x8x32xf32> to vector<2x8x32xf32>
    %12 = arith.addf %8, %11 : vector<2x8x32xf32>
    %13 = vector.shape_cast %12 : vector<2x8x32xf32> to vector<16x32xf32>
    %c0_8 = arith.constant 0 : index
    %c0_9 = arith.constant 0 : index
    %14 = vector.load %arg6[%c0_8, %c0_9] : memref<32x32xf32, #tpu.memory_space<vmem>>, vector<32x32xf32>
    %cst_10 = arith.constant dense<0.000000e+00> : vector<16x32xf32>
    %15 = tpu.matmul %13, %14, %cst_10 {dimension_numbers = #tpu.dot_dimension_numbers<[1], [0], [0], [1], [0, 0, 1, 1], [], []>} : vector<16x32xf32>, vector<32x32xf32>, vector<16x32xf32> -> vector<16x32xf32>
    %c0_11 = arith.constant 0 : index
    %c0_12 = arith.constant 0 : index
    %16 = vector.load %arg7[%c0_11, %c0_12] : memref<1x32xf32, #tpu.memory_space<vmem>>, vector<1x32xf32>
    %17 = vector.broadcast %16 : vector<1x32xf32> to vector<16x32xf32>
    %18 = arith.addf %15, %17 : vector<16x32xf32>
    %c0_13 = arith.constant 0 : index
    %c0_14 = arith.constant 0 : index
    %19 = vector.load %arg8[%c0_13, %c0_14] : memref<32x32xf32, #tpu.memory_space<vmem>>, vector<32x32xf32>
    %cst_15 = arith.constant dense<0.000000e+00> : vector<16x32xf32>
    %20 = tpu.matmul %13, %19, %cst_15 {dimension_numbers = #tpu.dot_dimension_numbers<[1], [0], [0], [1], [0, 0, 1, 1], [], []>} : vector<16x32xf32>, vector<32x32xf32>, vector<16x32xf32> -> vector<16x32xf32>
    %c0_16 = arith.constant 0 : index
    %c0_17 = arith.constant 0 : index
    %21 = vector.load %arg9[%c0_16, %c0_17] : memref<1x32xf32, #tpu.memory_space<vmem>>, vector<1x32xf32>
    %22 = vector.broadcast %21 : vector<1x32xf32> to vector<16x32xf32>
    %23 = arith.addf %20, %22 : vector<16x32xf32>
    %c0_18 = arith.constant 0 : index
    %c0_19 = arith.constant 0 : index
    %24 = vector.load %arg10[%c0_18, %c0_19] : memref<32x32xf32, #tpu.memory_space<vmem>>, vector<32x32xf32>
    %cst_20 = arith.constant dense<0.000000e+00> : vector<16x32xf32>
    %25 = tpu.matmul %13, %24, %cst_20 {dimension_numbers = #tpu.dot_dimension_numbers<[1], [0], [0], [1], [0, 0, 1, 1], [], []>} : vector<16x32xf32>, vector<32x32xf32>, vector<16x32xf32> -> vector<16x32xf32>
    %c0_21 = arith.constant 0 : index
    %c0_22 = arith.constant 0 : index
    %26 = vector.load %arg11[%c0_21, %c0_22] : memref<1x32xf32, #tpu.memory_space<vmem>>, vector<1x32xf32>
    %27 = vector.broadcast %26 : vector<1x32xf32> to vector<16x32xf32>
    %28 = arith.addf %25, %27 : vector<16x32xf32>
    %29 = vector.shape_cast %18 : vector<16x32xf32> to vector<2x8x4x8xf32>
    %30 = tpu.transpose %29, [0, 2, 1, 3] : vector<2x8x4x8xf32> -> vector<2x4x8x8xf32>
    %31 = vector.shape_cast %30 : vector<2x4x8x8xf32> to vector<8x8x8xf32>
    %32 = vector.shape_cast %23 : vector<16x32xf32> to vector<2x8x4x8xf32>
    %33 = tpu.transpose %32, [0, 2, 1, 3] : vector<2x8x4x8xf32> -> vector<2x4x8x8xf32>
    %34 = vector.shape_cast %33 : vector<2x4x8x8xf32> to vector<8x8x8xf32>
    %35 = vector.shape_cast %28 : vector<16x32xf32> to vector<2x8x4x8xf32>
    %36 = tpu.transpose %35, [0, 2, 1, 3] : vector<2x8x4x8xf32> -> vector<2x4x8x8xf32>
    %37 = vector.shape_cast %36 : vector<2x4x8x8xf32> to vector<8x8x8xf32>
    %c0_23 = arith.constant 0 : index
    %c0_24 = arith.constant 0 : index
    %c0_25 = arith.constant 0 : index
    %38 = vector.load %arg2[%c0_23, %c0_24, %c0_25] : memref<2x1x8xf32, #tpu.memory_space<vmem>>, vector<2x1x8xf32>
    %39 = vector.shape_cast %38 : vector<2x1x8xf32> to vector<2x1x1x8xf32>
    %40 = vector.shape_cast %39 : vector<2x1x1x8xf32> to vector<2x1x1x8xf32>
    %41 = vector.broadcast %40 : vector<2x1x1x8xf32> to vector<2x4x1x8xf32>
    %42 = vector.shape_cast %41 : vector<2x4x1x8xf32> to vector<8x1x8xf32>
    "tpu.trace_start"() <{level = 10 : i32, message = "nqd,nkd->nqk"}> : () -> ()
    %cst_26 = arith.constant dense<0.000000e+00> : vector<8x8x8xf32>
    %43 = tpu.matmul %31, %34, %cst_26 {dimension_numbers = #tpu.dot_dimension_numbers<[2], [2], [1], [1], [0, 0, 0, 1, 1, 1], [0], [0]>} : vector<8x8x8xf32>, vector<8x8x8xf32>, vector<8x8x8xf32> -> vector<8x8x8xf32>
    "tpu.trace_stop"() : () -> ()
    %44 = vector.broadcast %42 : vector<8x1x8xf32> to vector<8x8x8xf32>
    %45 = arith.addf %43, %44 : vector<8x8x8xf32>
    %cst_27 = arith.constant dense<0xFF800000> : vector<8x8xf32>
    %46 = vector.multi_reduction <maximumf>, %45, %cst_27 [2] : vector<8x8x8xf32> to vector<8x8xf32>
    %47 = vector.shape_cast %46 : vector<8x8xf32> to vector<8x8x1xf32>
    %48 = vector.broadcast %47 : vector<8x8x1xf32> to vector<8x8x8xf32>
    %49 = arith.subf %45, %48 : vector<8x8x8xf32>
    %50 = math.exp %49 : vector<8x8x8xf32>
    %cst_28 = arith.constant dense<0.000000e+00> : vector<8x8xf32>
    %51 = vector.multi_reduction <add>, %50, %cst_28 [2] : vector<8x8x8xf32> to vector<8x8xf32>
    %52 = vector.shape_cast %51 : vector<8x8xf32> to vector<8x8x1xf32>
    %53 = tpu.reciprocal %52 {approx = true} : vector<8x8x1xf32> -> vector<8x8x1xf32>
    %54 = vector.broadcast %53 : vector<8x8x1xf32> to vector<8x8x8xf32>
    %55 = arith.mulf %50, %54 : vector<8x8x8xf32>
    "tpu.trace_start"() <{level = 10 : i32, message = "nqk,nkd->nqd"}> : () -> ()
    %cst_29 = arith.constant dense<0.000000e+00> : vector<8x8x8xf32>
    %56 = tpu.matmul %55, %37, %cst_29 {dimension_numbers = #tpu.dot_dimension_numbers<[2], [1], [1], [2], [0, 0, 0, 1, 1, 2], [0], [0]>} : vector<8x8x8xf32>, vector<8x8x8xf32>, vector<8x8x8xf32> -> vector<8x8x8xf32>
    "tpu.trace_stop"() : () -> ()
    %57 = vector.shape_cast %56 : vector<8x8x8xf32> to vector<2x4x8x8xf32>
    %58 = tpu.transpose %57, [0, 2, 1, 3] : vector<2x4x8x8xf32> -> vector<2x8x4x8xf32>
    %59 = vector.shape_cast %58 : vector<2x8x4x8xf32> to vector<16x32xf32>
    %c0_30 = arith.constant 0 : index
    %c0_31 = arith.constant 0 : index
    %60 = vector.load %arg12[%c0_30, %c0_31] : memref<32x32xf32, #tpu.memory_space<vmem>>, vector<32x32xf32>
    %cst_32 = arith.constant dense<0.000000e+00> : vector<16x32xf32>
    %61 = tpu.matmul %59, %60, %cst_32 {dimension_numbers = #tpu.dot_dimension_numbers<[1], [0], [0], [1], [0, 0, 1, 1], [], []>} : vector<16x32xf32>, vector<32x32xf32>, vector<16x32xf32> -> vector<16x32xf32>
    %c0_33 = arith.constant 0 : index
    %c0_34 = arith.constant 0 : index
    %62 = vector.load %arg13[%c0_33, %c0_34] : memref<1x32xf32, #tpu.memory_space<vmem>>, vector<1x32xf32>
    %63 = vector.broadcast %62 : vector<1x32xf32> to vector<16x32xf32>
    %64 = arith.addf %61, %63 : vector<16x32xf32>
    %65 = arith.addf %13, %64 : vector<16x32xf32>
    %c0_35 = arith.constant 0 : index
    %c0_36 = arith.constant 0 : index
    %66 = vector.load %arg14[%c0_35, %c0_36] : memref<1x32xf32, #tpu.memory_space<vmem>>, vector<1x32xf32>
    %c0_37 = arith.constant 0 : index
    %c0_38 = arith.constant 0 : index
    %67 = vector.load %arg15[%c0_37, %c0_38] : memref<1x32xf32, #tpu.memory_space<vmem>>, vector<1x32xf32>
    %cst_39 = arith.constant dense<0.000000e+00> : vector<16xf32>
    %68 = vector.multi_reduction <add>, %65, %cst_39 [1] : vector<16x32xf32> to vector<16xf32>
    %69 = vector.shape_cast %68 : vector<16xf32> to vector<16x1xf32>
    %cst_40 = arith.constant 3.200000e+01 : f32
    %70 = vector.broadcast %cst_40 : f32 to vector<16x1xf32>
    %71 = arith.divf %69, %70 : vector<16x1xf32>
    %72 = vector.broadcast %71 : vector<16x1xf32> to vector<16x32xf32>
    %73 = arith.subf %65, %72 : vector<16x32xf32>
    %74 = arith.mulf %73, %73 : vector<16x32xf32>
    %cst_41 = arith.constant dense<0.000000e+00> : vector<16xf32>
    %75 = vector.multi_reduction <add>, %74, %cst_41 [1] : vector<16x32xf32> to vector<16xf32>
    %76 = vector.shape_cast %75 : vector<16xf32> to vector<16x1xf32>
    %cst_42 = arith.constant 3.100000e+01 : f32
    %77 = vector.broadcast %cst_42 : f32 to vector<16x1xf32>
    %78 = arith.divf %76, %77 : vector<16x1xf32>
    %79 = math.sqrt %78 : vector<16x1xf32>
    %cst_43 = arith.constant 9.99999997E-7 : f32
    %80 = vector.broadcast %cst_43 : f32 to vector<16x1xf32>
    %81 = arith.addf %79, %80 : vector<16x1xf32>
    %82 = tpu.reciprocal %81 {approx = true} : vector<16x1xf32> -> vector<16x1xf32>
    %83 = vector.broadcast %71 : vector<16x1xf32> to vector<16x32xf32>
    %84 = arith.subf %65, %83 : vector<16x32xf32>
    %85 = vector.broadcast %66 : vector<1x32xf32> to vector<16x32xf32>
    %86 = vector.broadcast %82 : vector<16x1xf32> to vector<16x32xf32>
    %87 = arith.mulf %85, %86 : vector<16x32xf32>
    %88 = arith.mulf %84, %87 : vector<16x32xf32>
    %89 = vector.broadcast %67 : vector<1x32xf32> to vector<16x32xf32>
    %90 = arith.addf %88, %89 : vector<16x32xf32>
    %c0_44 = arith.constant 0 : index
    %c0_45 = arith.constant 0 : index
    %91 = vector.load %arg16[%c0_44, %c0_45] : memref<32x64xf32, #tpu.memory_space<vmem>>, vector<32x64xf32>
    %cst_46 = arith.constant dense<0.000000e+00> : vector<16x64xf32>
    %92 = tpu.matmul %90, %91, %cst_46 {dimension_numbers = #tpu.dot_dimension_numbers<[1], [0], [0], [1], [0, 0, 1, 1], [], []>} : vector<16x32xf32>, vector<32x64xf32>, vector<16x64xf32> -> vector<16x64xf32>
    %c0_47 = arith.constant 0 : index
    %c0_48 = arith.constant 0 : index
    %93 = vector.load %arg17[%c0_47, %c0_48] : memref<1x64xf32, #tpu.memory_space<vmem>>, vector<1x64xf32>
    %94 = vector.broadcast %93 : vector<1x64xf32> to vector<16x64xf32>
    %95 = arith.addf %92, %94 : vector<16x64xf32>
    %cst_49 = arith.constant 0.000000e+00 : f32
    %96 = vector.broadcast %cst_49 : f32 to vector<16x64xf32>
    %97 = arith.maximumf %95, %96 : vector<16x64xf32>
    %c0_50 = arith.constant 0 : index
    %c0_51 = arith.constant 0 : index
    %98 = vector.load %arg18[%c0_50, %c0_51] : memref<64x32xf32, #tpu.memory_space<vmem>>, vector<64x32xf32>
    %cst_52 = arith.constant dense<0.000000e+00> : vector<16x32xf32>
    %99 = tpu.matmul %97, %98, %cst_52 {dimension_numbers = #tpu.dot_dimension_numbers<[1], [0], [0], [1], [0, 0, 1, 1], [], []>} : vector<16x64xf32>, vector<64x32xf32>, vector<16x32xf32> -> vector<16x32xf32>
    %c0_53 = arith.constant 0 : index
    %c0_54 = arith.constant 0 : index
    %100 = vector.load %arg19[%c0_53, %c0_54] : memref<1x32xf32, #tpu.memory_space<vmem>>, vector<1x32xf32>
    %101 = vector.broadcast %100 : vector<1x32xf32> to vector<16x32xf32>
    %102 = arith.addf %99, %101 : vector<16x32xf32>
    %103 = arith.addf %90, %102 : vector<16x32xf32>
    %c0_55 = arith.constant 0 : index
    %c0_56 = arith.constant 0 : index
    %104 = vector.load %arg20[%c0_55, %c0_56] : memref<1x32xf32, #tpu.memory_space<vmem>>, vector<1x32xf32>
    %c0_57 = arith.constant 0 : index
    %c0_58 = arith.constant 0 : index
    %105 = vector.load %arg21[%c0_57, %c0_58] : memref<1x32xf32, #tpu.memory_space<vmem>>, vector<1x32xf32>
    %cst_59 = arith.constant dense<0.000000e+00> : vector<16xf32>
    %106 = vector.multi_reduction <add>, %103, %cst_59 [1] : vector<16x32xf32> to vector<16xf32>
    %107 = vector.shape_cast %106 : vector<16xf32> to vector<16x1xf32>
    %cst_60 = arith.constant 3.200000e+01 : f32
    %108 = vector.broadcast %cst_60 : f32 to vector<16x1xf32>
    %109 = arith.divf %107, %108 : vector<16x1xf32>
    %110 = vector.broadcast %109 : vector<16x1xf32> to vector<16x32xf32>
    %111 = arith.subf %103, %110 : vector<16x32xf32>
    %112 = arith.mulf %111, %111 : vector<16x32xf32>
    %cst_61 = arith.constant dense<0.000000e+00> : vector<16xf32>
    %113 = vector.multi_reduction <add>, %112, %cst_61 [1] : vector<16x32xf32> to vector<16xf32>
    %114 = vector.shape_cast %113 : vector<16xf32> to vector<16x1xf32>
    %cst_62 = arith.constant 3.100000e+01 : f32
    %115 = vector.broadcast %cst_62 : f32 to vector<16x1xf32>
    %116 = arith.divf %114, %115 : vector<16x1xf32>
    %117 = math.sqrt %116 : vector<16x1xf32>
    %cst_63 = arith.constant 9.99999997E-7 : f32
    %118 = vector.broadcast %cst_63 : f32 to vector<16x1xf32>
    %119 = arith.addf %117, %118 : vector<16x1xf32>
    %120 = tpu.reciprocal %119 {approx = true} : vector<16x1xf32> -> vector<16x1xf32>
    %121 = vector.broadcast %109 : vector<16x1xf32> to vector<16x32xf32>
    %122 = arith.subf %103, %121 : vector<16x32xf32>
    %123 = vector.broadcast %104 : vector<1x32xf32> to vector<16x32xf32>
    %124 = vector.broadcast %120 : vector<16x1xf32> to vector<16x32xf32>
    %125 = arith.mulf %123, %124 : vector<16x32xf32>
    %126 = arith.mulf %122, %125 : vector<16x32xf32>
    %127 = vector.broadcast %105 : vector<1x32xf32> to vector<16x32xf32>
    %128 = arith.addf %126, %127 : vector<16x32xf32>
    %129 = vector.shape_cast %128 : vector<16x32xf32> to vector<2x8x32xf32>
    %cst_64 = arith.constant dense<0xFF800000> : vector<2x32xf32>
    %130 = vector.multi_reduction <maximumf>, %129, %cst_64 [1] : vector<2x8x32xf32> to vector<2x32xf32>
    %c0_65 = arith.constant 0 : index
    %c0_66 = arith.constant 0 : index
    %131 = vector.load %arg22[%c0_65, %c0_66] : memref<2x32xf32, #tpu.memory_space<vmem>>, vector<2x32xf32>
    tpu.vector_store %arg22[%c0_65, %c0_66], %130 {strides = array<i32>} : memref<2x32xf32, #tpu.memory_space<vmem>>, vector<2x32xf32>,
    return
  }
  func.func @transform_0(%arg0: i32) -> (i32, i32) {
    %c0_i32 = arith.constant 0 : i32
    %c0_i32_0 = arith.constant 0 : i32
    return %arg0, %c0_i32 : i32, i32
  }
  func.func @transform_1(%arg0: i32) -> (i32, i32, i32) {
    %c0_i32 = arith.constant 0 : i32
    %c0_i32_0 = arith.constant 0 : i32
    %c0_i32_1 = arith.constant 0 : i32
    return %arg0, %c0_i32, %c0_i32_0 : i32, i32, i32
  }
  func.func @transform_2(%arg0: i32) -> (i32, i32) {
    %c0_i32 = arith.constant 0 : i32
    %c0_i32_0 = arith.constant 0 : i32
    %c0_i32_1 = arith.constant 0 : i32
    return %c0_i32, %c0_i32_0 : i32, i32
  }
  func.func @transform_3(%arg0: i32) -> (i32, i32) {
    %c0_i32 = arith.constant 0 : i32
    %c0_i32_0 = arith.constant 0 : i32
    %c0_i32_1 = arith.constant 0 : i32
    return %c0_i32, %c0_i32_0 : i32, i32
  }
  func.func @transform_4(%arg0: i32) -> (i32, i32) {
    %c0_i32 = arith.constant 0 : i32
    %c0_i32_0 = arith.constant 0 : i32
    %c0_i32_1 = arith.constant 0 : i32
    return %c0_i32, %c0_i32_0 : i32, i32
  }
  func.func @transform_5(%arg0: i32) -> (i32, i32) {
    %c0_i32 = arith.constant 0 : i32
    %c0_i32_0 = arith.constant 0 : i32
    %c0_i32_1 = arith.constant 0 : i32
    return %c0_i32, %c0_i32_0 : i32, i32
  }
  func.func @transform_6(%arg0: i32) -> (i32, i32) {
    %c0_i32 = arith.constant 0 : i32
    %c0_i32_0 = arith.constant 0 : i32
    %c0_i32_1 = arith.constant 0 : i32
    return %c0_i32, %c0_i32_0 : i32, i32
  }
  func.func @transform_7(%arg0: i32) -> (i32, i32) {
    %c0_i32 = arith.constant 0 : i32
    %c0_i32_0 = arith.constant 0 : i32
    %c0_i32_1 = arith.constant 0 : i32
    return %c0_i32, %c0_i32_0 : i32, i32
  }
  func.func @transform_8(%arg0: i32) -> (i32, i32) {
    %c0_i32 = arith.constant 0 : i32
    %c0_i32_0 = arith.constant 0 : i32
    %c0_i32_1 = arith.constant 0 : i32
    return %c0_i32, %c0_i32_0 : i32, i32
  }
  func.func @transform_9(%arg0: i32) -> (i32, i32) {
    %c0_i32 = arith.constant 0 : i32
    %c0_i32_0 = arith.constant 0 : i32
    %c0_i32_1 = arith.constant 0 : i32
    return %c0_i32, %c0_i32_0 : i32, i32
  }
  func.func @transform_10(%arg0: i32) -> (i32, i32) {
    %c0_i32 = arith.constant 0 : i32
    %c0_i32_0 = arith.constant 0 : i32
    %c0_i32_1 = arith.constant 0 : i32
    return %c0_i32, %c0_i32_0 : i32, i32
  }
  func.func @transform_11(%arg0: i32) -> (i32, i32) {
    %c0_i32 = arith.constant 0 : i32
    %c0_i32_0 = arith.constant 0 : i32
    %c0_i32_1 = arith.constant 0 : i32
    return %c0_i32, %c0_i32_0 : i32, i32
  }
  func.func @transform_12(%arg0: i32) -> (i32, i32) {
    %c0_i32 = arith.constant 0 : i32
    %c0_i32_0 = arith.constant 0 : i32
    %c0_i32_1 = arith.constant 0 : i32
    return %c0_i32, %c0_i32_0 : i32, i32
  }
  func.func @transform_13(%arg0: i32) -> (i32, i32) {
    %c0_i32 = arith.constant 0 : i32
    %c0_i32_0 = arith.constant 0 : i32
    %c0_i32_1 = arith.constant 0 : i32
    return %c0_i32, %c0_i32_0 : i32, i32
  }
  func.func @transform_14(%arg0: i32) -> (i32, i32) {
    %c0_i32 = arith.constant 0 : i32
    %c0_i32_0 = arith.constant 0 : i32
    %c0_i32_1 = arith.constant 0 : i32
    return %c0_i32, %c0_i32_0 : i32, i32
  }
  func.func @transform_15(%arg0: i32) -> (i32, i32) {
    %c0_i32 = arith.constant 0 : i32
    %c0_i32_0 = arith.constant 0 : i32
    %c0_i32_1 = arith.constant 0 : i32
    return %c0_i32, %c0_i32_0 : i32, i32
  }
  func.func @transform_16(%arg0: i32) -> (i32, i32) {
    %c0_i32 = arith.constant 0 : i32
    %c0_i32_0 = arith.constant 0 : i32
    %c0_i32_1 = arith.constant 0 : i32
    return %c0_i32, %c0_i32_0 : i32, i32
  }
  func.func @transform_17(%arg0: i32) -> (i32, i32) {
    %c0_i32 = arith.constant 0 : i32
    %c0_i32_0 = arith.constant 0 : i32
    %c0_i32_1 = arith.constant 0 : i32
    return %c0_i32, %c0_i32_0 : i32, i32
  }
  func.func @transform_18(%arg0: i32) -> (i32, i32) {
    %c0_i32 = arith.constant 0 : i32
    %c0_i32_0 = arith.constant 0 : i32
    %c0_i32_1 = arith.constant 0 : i32
    return %c0_i32, %c0_i32_0 : i32, i32
  }
  func.func @transform_19(%arg0: i32) -> (i32, i32) {
    %c0_i32 = arith.constant 0 : i32
    %c0_i32_0 = arith.constant 0 : i32
    %c0_i32_1 = arith.constant 0 : i32
    return %c0_i32, %c0_i32_0 : i32, i32
  }
  func.func @transform_20(%arg0: i32) -> (i32, i32) {
    %c0_i32 = arith.constant 0 : i32
    %c0_i32_0 = arith.constant 0 : i32
    %c0_i32_1 = arith.constant 0 : i32
    return %c0_i32, %c0_i32_0 : i32, i32
  }
  func.func @transform_21(%arg0: i32) -> (i32, i32) {
    %c0_i32 = arith.constant 0 : i32
    %c0_i32_0 = arith.constant 0 : i32
    return %arg0, %c0_i32 : i32, i32
  }
}

</mosaic_0001>

<bundles_post_ra>
// kernel: tpu_custom_call.1
= control target key start
LH: loop header
LB: loop body
LE: loop exit
PB: predicated region body
PF: predicated region fallthrough
CT: control target
= control target key end

     0   :  { %s5065_s0 = inlined_call_operand.hbm [shape: f32[16,16], index: 0, kind: input, shape index: {}]   ;;  %s5066_s1 = inlined_call_operand.hbm [shape: f32[2,1,8], index: 1, kind: input, shape index: {}]   ;;  %s5067_s2 = inlined_call_operand.hbm [shape: f32[16,32], index: 2, kind: input, shape index: {}]   ;;  %s5068_s3 = inlined_call_operand.hbm [shape: f32[1,32], index: 3, kind: input, shape index: {}]   ;;  %s5069_s4 = inlined_call_operand.hbm [shape: f32[8,32], index: 4, kind: input, shape index: {}]   ;;  %s5070_s5 = inlined_call_operand.vmem [shape: f32[32,32], index: 5, kind: input, shape index: {}]   ;;  %s5071_s6 = inlined_call_operand.hbm [shape: f32[1,32], index: 6, kind: input, shape index: {}]   ;;  %s5072_s7 = inlined_call_operand.vmem [shape: f32[32,32], index: 7, kind: input, shape index: {}]   ;;  %s5073_s8 = inlined_call_operand.hbm [shape: f32[1,32], index: 8, kind: input, shape index: {}]   ;;  %s5074_s9 = inlined_call_operand.vmem [shape: f32[32,32], index: 9, kind: input, shape index: {}]   ;;  %s5075_s10 = inlined_call_operand.hbm [shape: f32[1,32], index: 10, kind: input, shape index: {}]   ;;  %s5076_s11 = inlined_call_operand.vmem [shape: f32[32,32], index: 11, kind: input, shape index: {}]   ;;  %s5077_s12 = inlined_call_operand.hbm [shape: f32[1,32], index: 12, kind: input, shape index: {}]   ;;  %s5078_s13 = inlined_call_operand.hbm [shape: f32[1,32], index: 13, kind: input, shape index: {}]   ;;  %s5079_s14 = inlined_call_operand.hbm [shape: f32[1,32], index: 14, kind: input, shape index: {}]   ;;  %s5080_s15 = inlined_call_operand.hbm [shape: f32[32,64], index: 15, kind: input, shape index: {}]   ;;  %s5081_s16 = inlined_call_operand.hbm [shape: f32[1,64], index: 16, kind: input, shape index: {}]   ;;  %s5082_s17 = inlined_call_operand.vmem [shape: f32[64,32], index: 17, kind: input, shape index: {}]   ;;  %s5083_s18 = inlined_call_operand.vmem [shape: f32[1,32], index: 18, kind: input, shape index: {}]   ;;  %s5084_s19 = inlined_call_operand.vmem [shape: f32[1,32], index: 19, kind: input, shape index: {}]   ;;  %s5085_s20 = inlined_call_operand.vmem [shape: f32[1,32], index: 20, kind: input, shape index: {}]   ;;  %s5086_s21 = inlined_call_operand.hbm [shape: f32[2,32], index: 21, kind: output, shape index: {}]  }
   0x1   :  { %5094 = sst [smem:[#allocation32_spill]] %s5065_s0 }
   0x2   :  { %5095 = sst [smem:[#allocation33_spill]] %s5066_s1 }
   0x3   :  { %5096 = sst [smem:[#allocation34_spill]] %s5067_s2 }
   0x4   :  { %5097 = sst [smem:[#allocation35_spill]] %s5068_s3 }
   0x5   :  { %5098 = sst [smem:[#allocation36_spill]] %s5069_s4 }
   0x6   :  { %5099 = sst [smem:[#allocation37_spill]] %s5070_s5 }
   0x7   :  { %5100 = sst [smem:[#allocation38_spill]] %s5084_s19 }
   0x8   :  { %5101 = sst [smem:[#allocation39_spill]] %s5085_s20 }
   0x9   :  { %5102 = sst [smem:[#allocation40_spill]] %s5086_s21 }
   0xa   :  { %26 = vsyncpa [#allocation3], 0 }
   0xb   :  { %27 = vsyncpa [#allocation6], 0 }
   0xc   :  { %28 = vsyncpa [#allocation9], 0 }
   0xd   :  { %29 = vsyncpa [#allocation12], 0 }
   0xe   :  { %30 = vsyncpa [#allocation15], 0 }
   0xf   :  { %31 = vsyncpa [#allocation18], 0 }
  0x10   :  { %32 = vsyncpa [#allocation21], 0 }
  0x11   :  { %33 = vsyncpa [#allocation4], 0  ;;  %s4273_s2 = smov [#allocation5]   ;;  %s5103_s3 = sld [smem:[#allocation33_spill]] }
  0x12   :  { %s51_s25 = sshll.u32 %s4273_s2, 4  ;;  %s52_s25 = int_to_ptr.vmem [resolvable:$true] %s51_s25 }
  0x17   :  { %s3949_s28 = scalar_lea.hbm %s5103_s3, 32 }
  0x18   :  { %p3950_p0 = scmp.ne.s32.totalorder %s5103_s3, %s3949_s28  ;;  %p3953_p1 = scmp.lt.u32.totalorder %s3949_s28, %s5103_s3 }
  0x1a   :  { %p3955_p2 = pnand %p3953_p1, %p3950_p0 }
  0x1c   :  { %3958 = shalt.err (!%p3955_p2)
}
  0x1d   :  { %s3959_s5 = scalar_lea.vmem %s52_s25, 32  ;;  %p3964_p4 = scmp.lt.s32.totalorder %s52_s25, %s52_s25 }
  0x1e   :  { %p3960_p3 = scmp.ne.s32.totalorder %s52_s25, %s3959_s5  ;;  %p3965_p5 = scmp.lt.s32.totalorder %s3959_s5, %s3959_s5 }
  0x20   :  { %p3966_p6 = por %p3965_p5, %p3964_p4 }
  0x22   :  { %p3967_p7 = pnand %p3966_p6, %p3960_p3 }
  0x24   :  { %3970 = shalt.err (!%p3967_p7)
}
  0x25   :  { %s4274_s22 = smov 16   ;;  %s4275_s23 = smov 1  }
  0x26   :  { %57 = dma.hbm_to_vmem [thread:$0]  %s5103_s3, 32, %s52_s25, [#allocation6], %s4274_s22, %s4274_s22, %s4275_s23  }
  0x27   :  { %s4276_s2 = smov [#allocation8]   ;;  %s4277_s27 = smov [#allocation11]  }
  0x28   :  { %s76_s26 = sshll.u32 %s4276_s2, 4  ;;  %s98_s28 = sshll.u32 %s4277_s27, 4  ;;  %s77_s26 = int_to_ptr.vmem [resolvable:$true] %s76_s26  ;;  %s99_s28 = int_to_ptr.vmem [resolvable:$true] %s98_s28 }
  0x29   :  { %s5104_s4 = sld [smem:[#allocation35_spill]] }
  0x2f   :  { %s3971_s30 = scalar_lea.hbm %s5104_s4, 16 }
  0x30   :  { %p3972_p8 = scmp.ne.s32.totalorder %s5104_s4, %s3971_s30  ;;  %p3975_p9 = scmp.lt.u32.totalorder %s3971_s30, %s5104_s4 }
  0x32   :  { %p3977_p10 = pnand %p3975_p9, %p3972_p8 }
  0x34   :  { %3980 = shalt.err (!%p3977_p10)
}
  0x35   :  { %s3981_s25 = scalar_lea.vmem %s77_s26, 16  ;;  %s3985_s3 = scalar_lea.vmem %s77_s26, 32 }
  0x36   :  { %p3982_p11 = scmp.ne.s32.totalorder %s77_s26, %s3981_s25  ;;  %p3986_p12 = scmp.lt.s32.totalorder %s77_s26, %s77_s26 }
  0x37   :  { %p3987_p13 = scmp.lt.s32.totalorder %s3985_s3, %s3981_s25 }
  0x39   :  { %p3988_p0 = por %p3987_p13, %p3986_p12 }
  0x3b   :  { %p3989_p1 = pnand %p3988_p0, %p3982_p11 }
  0x3d   :  { %3992 = shalt.err (!%p3989_p1)
}
  0x3e   :  { %79 = dma.hbm_to_vmem [thread:$0]  %s5104_s4, 16, %s77_s26, [#allocation9]  }
  0x3f   :  { %s3993_s19 = scalar_lea.hbm %s5071_s6, 16 }
  0x40   :  { %p3994_p2 = scmp.ne.s32.totalorder %s5071_s6, %s3993_s19  ;;  %p3997_p3 = scmp.lt.u32.totalorder %s3993_s19, %s5071_s6 }
  0x42   :  { %p3999_p4 = pnand %p3997_p3, %p3994_p2 }
  0x44   :  { %4002 = shalt.err (!%p3999_p4)
}
  0x45   :  { %s4003_s0 = scalar_lea.vmem %s99_s28, 16  ;;  %s4007_s30 = scalar_lea.vmem %s99_s28, 32 }
  0x46   :  { %p4004_p5 = scmp.ne.s32.totalorder %s99_s28, %s4003_s0  ;;  %p4008_p6 = scmp.lt.s32.totalorder %s99_s28, %s99_s28 }
  0x47   :  { %p4009_p7 = scmp.lt.s32.totalorder %s4007_s30, %s4003_s0 }
  0x49   :  { %p4010_p8 = por %p4009_p7, %p4008_p6 }
  0x4b   :  { %p4011_p9 = pnand %p4010_p8, %p4004_p5 }
  0x4d   :  { %4014 = shalt.err (!%p4011_p9)
}
  0x4e   :  { %101 = dma.hbm_to_vmem [thread:$0]  %s5071_s6, 16, %s99_s28, [#allocation12]  }
  0x4f   :  { %s4278_s5 = smov [#allocation14]   ;;  %s4279_s3 = smov [#allocation17]  }
  0x50   :  { %s122_s25 = sshll.u32 %s4278_s5, 4  ;;  %s144_s23 = sshll.u32 %s4279_s3, 4  ;;  %s123_s25 = int_to_ptr.vmem [resolvable:$true] %s122_s25  ;;  %s145_s23 = int_to_ptr.vmem [resolvable:$true] %s144_s23 }
  0x51   :  { %s4015_s24 = scalar_lea.hbm %s5075_s10, 16 }
  0x52   :  { %p4016_p10 = scmp.ne.s32.totalorder %s5075_s10, %s4015_s24  ;;  %p4019_p11 = scmp.lt.u32.totalorder %s4015_s24, %s5075_s10 }
  0x54   :  { %p4021_p12 = pnand %p4019_p11, %p4016_p10 }
  0x56   :  { %4024 = shalt.err (!%p4021_p12)
}
  0x57   :  { %s4025_s6 = scalar_lea.vmem %s123_s25, 16  ;;  %s4029_s28 = scalar_lea.vmem %s123_s25, 32 }
  0x58   :  { %p4026_p13 = scmp.ne.s32.totalorder %s123_s25, %s4025_s6  ;;  %p4030_p0 = scmp.lt.s32.totalorder %s123_s25, %s123_s25 }
  0x59   :  { %p4031_p1 = scmp.lt.s32.totalorder %s4029_s28, %s4025_s6 }
  0x5b   :  { %p4032_p2 = por %p4031_p1, %p4030_p0 }
  0x5d   :  { %p4033_p3 = pnand %p4032_p2, %p4026_p13 }
  0x5f   :  { %4036 = shalt.err (!%p4033_p3)
}
  0x60   :  { %125 = dma.hbm_to_vmem [thread:$0]  %s5075_s10, 16, %s123_s25, [#allocation15]  }
  0x61   :  { %s4037_s4 = scalar_lea.hbm %s5078_s13, 16 }
  0x62   :  { %p4038_p4 = scmp.ne.s32.totalorder %s5078_s13, %s4037_s4  ;;  %p4041_p5 = scmp.lt.u32.totalorder %s4037_s4, %s5078_s13 }
  0x64   :  { %p4043_p6 = pnand %p4041_p5, %p4038_p4 }
  0x66   :  { %4046 = shalt.err (!%p4043_p6)
}
  0x67   :  { %s4047_s24 = scalar_lea.vmem %s145_s23, 16  ;;  %s4051_s19 = scalar_lea.vmem %s145_s23, 32 }
  0x68   :  { %p4048_p7 = scmp.ne.s32.totalorder %s145_s23, %s4047_s24  ;;  %p4052_p8 = scmp.lt.s32.totalorder %s145_s23, %s145_s23 }
  0x69   :  { %p4053_p9 = scmp.lt.s32.totalorder %s4051_s19, %s4047_s24 }
  0x6b   :  { %p4054_p10 = por %p4053_p9, %p4052_p8 }
  0x6d   :  { %p4055_p11 = pnand %p4054_p10, %p4048_p7 }
  0x6f   :  { %4058 = shalt.err (!%p4055_p11)
}
  0x70   :  { %147 = dma.hbm_to_vmem [thread:$0]  %s5078_s13, 16, %s145_s23, [#allocation18]  }
  0x71   :  { %s4280_s20 = smov [#allocation20]   ;;  %s4281_s27 = smov [#allocation2]  }
  0x72   :  { %s163_s2 = sshll.u32 %s4280_s20, 4  ;;  %s39_s6 = sshll.u32 %s4281_s27, 4  ;;  %s164_s2 = int_to_ptr.vmem [resolvable:$true] %s163_s2  ;;  %s40_s6 = int_to_ptr.vmem [resolvable:$true] %s39_s6 }
  0x73   :  { %s4059_s0 = scalar_lea.hbm %s5080_s15, 512 }
  0x74   :  { %p4060_p12 = scmp.ne.s32.totalorder %s5080_s15, %s4059_s0  ;;  %p4063_p13 = scmp.lt.u32.totalorder %s4059_s0, %s5080_s15 }
  0x76   :  { %p4065_p0 = pnand %p4063_p13, %p4060_p12 }
  0x78   :  { %4068 = shalt.err (!%p4065_p0)
}
  0x79   :  { %s4069_s13 = scalar_lea.vmem %s164_s2, 512  ;;  %p4074_p2 = scmp.lt.s32.totalorder %s164_s2, %s164_s2 }
  0x7a   :  { %p4070_p1 = scmp.ne.s32.totalorder %s164_s2, %s4069_s13  ;;  %p4075_p3 = scmp.lt.s32.totalorder %s4069_s13, %s4069_s13 }
  0x7c   :  { %p4076_p4 = por %p4075_p3, %p4074_p2 }
  0x7e   :  { %p4077_p5 = pnand %p4076_p4, %p4070_p1 }
  0x80   :  { %4080 = shalt.err (!%p4077_p5)
}
  0x81   :  { %s4282_s23 = smov 128   ;;  %s4283_s3 = smov 8  }
  0x82   :  { %169 = dma.hbm_to_vmem [thread:$0]  %s5080_s15, 512, %s164_s2, [#allocation21], %s4282_s23, %s4282_s23, %s4283_s3  }
  0x83   :  { %s5105_s10 = sld [smem:[#allocation32_spill]] }
  0x89   :  { %s4081_s25 = scalar_lea.hbm %s5105_s10, 256 }
  0x8a   :  { %p4082_p6 = scmp.ne.s32.totalorder %s5105_s10, %s4081_s25  ;;  %p4085_p7 = scmp.lt.u32.totalorder %s4081_s25, %s5105_s10 }
  0x8c   :  { %p4087_p8 = pnand %p4085_p7, %p4082_p6 }
  0x8e   :  { %4090 = shalt.err (!%p4087_p8)
}
  0x8f   :  { %s4091_s0 = scalar_lea.vmem %s40_s6, 256  ;;  %p4096_p10 = scmp.lt.s32.totalorder %s40_s6, %s40_s6 }
  0x90   :  { %p4092_p9 = scmp.ne.s32.totalorder %s40_s6, %s4091_s0  ;;  %p4097_p11 = scmp.lt.s32.totalorder %s4091_s0, %s4091_s0 }
  0x92   :  { %p4098_p12 = por %p4097_p11, %p4096_p10 }
  0x94   :  { %p4099_p13 = pnand %p4098_p12, %p4092_p9 }
  0x96   :  { %4102 = shalt.err (!%p4099_p13)
}
  0x97   :  { %45 = dma.hbm_to_vmem [thread:$0]  %s5105_s10, 256, %s40_s6, [#allocation3], %s4282_s23, %s4282_s23, %s4283_s3  }
  0x98   :  { %s4284_s30 = smov [#allocation7]   ;;  %s4285_s4 = smov [#allocation10]  }
  0x99   :  { %s63_s26 = sshll.u32 %s4284_s30, 4  ;;  %s86_s5 = sshll.u32 %s4285_s4, 4  ;;  %s64_s26 = int_to_ptr.vmem [resolvable:$true] %s63_s26  ;;  %s87_s5 = int_to_ptr.vmem [resolvable:$true] %s86_s5 }
  0x9a   :  { %s5106_s21 = sld [smem:[#allocation34_spill]] }
  0xa0   :  { %s4103_s24 = scalar_lea.hbm %s5106_s21, 256 }
  0xa1   :  { %p4104_p0 = scmp.ne.s32.totalorder %s5106_s21, %s4103_s24  ;;  %p4107_p1 = scmp.lt.u32.totalorder %s4103_s24, %s5106_s21 }
  0xa3   :  { %p4109_p2 = pnand %p4107_p1, %p4104_p0 }
  0xa5   :  { %4112 = shalt.err (!%p4109_p2)
}
  0xa6   :  { %s4113_s6 = scalar_lea.vmem %s64_s26, 256  ;;  %p4118_p4 = scmp.lt.s32.totalorder %s64_s26, %s64_s26 }
  0xa7   :  { %p4114_p3 = scmp.ne.s32.totalorder %s64_s26, %s4113_s6  ;;  %p4119_p5 = scmp.lt.s32.totalorder %s4113_s6, %s4113_s6 }
  0xa9   :  { %p4120_p6 = por %p4119_p5, %p4118_p4 }
  0xab   :  { %p4121_p7 = pnand %p4120_p6, %p4114_p3 }
  0xad   :  { %4124 = shalt.err (!%p4121_p7)
}
  0xae   :  { %69 = dma.hbm_to_vmem [thread:$0]  %s5106_s21, 256, %s64_s26, [#allocation6], %s4282_s23, %s4282_s23, %s4283_s3  }
  0xaf   :  { %s5107_s15 = sld [smem:[#allocation36_spill]] }
  0xb5   :  { %s4125_s2 = scalar_lea.hbm %s5107_s15, 128 }
  0xb6   :  { %p4126_p8 = scmp.ne.s32.totalorder %s5107_s15, %s4125_s2  ;;  %p4129_p9 = scmp.lt.u32.totalorder %s4125_s2, %s5107_s15 }
  0xb8   :  { %p4131_p10 = pnand %p4129_p9, %p4126_p8 }
  0xba   :  { %4134 = shalt.err (!%p4131_p10)
}
  0xbb   :  { %s4135_s24 = scalar_lea.vmem %s87_s5, 128  ;;  %p4140_p12 = scmp.lt.s32.totalorder %s87_s5, %s87_s5 }
  0xbc   :  { %p4136_p11 = scmp.ne.s32.totalorder %s87_s5, %s4135_s24  ;;  %p4141_p13 = scmp.lt.s32.totalorder %s4135_s24, %s4135_s24 }
  0xbe   :  { %p4142_p0 = por %p4141_p13, %p4140_p12 }
  0xc0   :  { %p4143_p1 = pnand %p4142_p0, %p4136_p11 }
  0xc2   :  { %4146 = shalt.err (!%p4143_p1)
}
  0xc3   :  { %89 = dma.hbm_to_vmem [thread:$0]  %s5107_s15, 128, %s87_s5, [#allocation9]  }
  0xc4   :  { %s4286_s21 = smov [#allocation13]   ;;  %s4287_s25 = smov [#allocation16]  }
  0xc5   :  { %s110_s19 = sshll.u32 %s4286_s21, 4  ;;  %s134_s20 = sshll.u32 %s4287_s25, 4  ;;  %s111_s19 = int_to_ptr.vmem [resolvable:$true] %s110_s19  ;;  %s135_s20 = int_to_ptr.vmem [resolvable:$true] %s134_s20 }
  0xc6   :  { %s4147_s10 = scalar_lea.hbm %s5073_s8, 16 }
  0xc7   :  { %p4148_p2 = scmp.ne.s32.totalorder %s5073_s8, %s4147_s10  ;;  %p4151_p3 = scmp.lt.u32.totalorder %s4147_s10, %s5073_s8 }
  0xc9   :  { %p4153_p4 = pnand %p4151_p3, %p4148_p2 }
  0xcb   :  { %4156 = shalt.err (!%p4153_p4)
}
  0xcc   :  { %s4157_s5 = scalar_lea.vmem %s111_s19, 16  ;;  %s4161_s15 = scalar_lea.vmem %s111_s19, 32 }
  0xcd   :  { %p4158_p5 = scmp.ne.s32.totalorder %s111_s19, %s4157_s5  ;;  %p4162_p6 = scmp.lt.s32.totalorder %s111_s19, %s111_s19 }
  0xce   :  { %p4163_p7 = scmp.lt.s32.totalorder %s4161_s15, %s4157_s5 }
  0xd0   :  { %p4164_p8 = por %p4163_p7, %p4162_p6 }
  0xd2   :  { %p4165_p9 = pnand %p4164_p8, %p4158_p5 }
  0xd4   :  { %4168 = shalt.err (!%p4165_p9)
}
  0xd5   :  { %113 = dma.hbm_to_vmem [thread:$0]  %s5073_s8, 16, %s111_s19, [#allocation12]  }
  0xd6   :  { %s4169_s24 = scalar_lea.hbm %s5077_s12, 16 }
  0xd7   :  { %p4170_p10 = scmp.ne.s32.totalorder %s5077_s12, %s4169_s24  ;;  %p4173_p11 = scmp.lt.u32.totalorder %s4169_s24, %s5077_s12 }
  0xd9   :  { %p4175_p12 = pnand %p4173_p11, %p4170_p10 }
  0xdb   :  { %4178 = shalt.err (!%p4175_p12)
}
  0xdc   :  { %s4179_s27 = scalar_lea.vmem %s135_s20, 16  ;;  %s4183_s6 = scalar_lea.vmem %s135_s20, 32 }
  0xdd   :  { %p4180_p13 = scmp.ne.s32.totalorder %s135_s20, %s4179_s27  ;;  %p4184_p0 = scmp.lt.s32.totalorder %s135_s20, %s135_s20 }
  0xde   :  { %p4185_p1 = scmp.lt.s32.totalorder %s4183_s6, %s4179_s27 }
  0xe0   :  { %p4186_p2 = por %p4185_p1, %p4184_p0 }
  0xe2   :  { %p4187_p3 = pnand %p4186_p2, %p4180_p13 }
  0xe4   :  { %4190 = shalt.err (!%p4187_p3)
}
  0xe5   :  { %137 = dma.hbm_to_vmem [thread:$0]  %s5077_s12, 16, %s135_s20, [#allocation15]  }
  0xe6   :  { %s4288_s10 = smov [#allocation19]   ;;  %s4289_s29 = smov [#allocation22]  }
  0xe7   :  { %s154_s28 = sshll.u32 %s4288_s10, 4  ;;  %s176_s0 = sshll.u32 %s4289_s29, 4  ;;  %s155_s28 = int_to_ptr.vmem [resolvable:$true] %s154_s28  ;;  %s177_s0 = int_to_ptr.vmem [resolvable:$true] %s176_s0 }
  0xe8   :  { %s4191_s15 = scalar_lea.hbm %s5079_s14, 16 }
  0xe9   :  { %p4192_p4 = scmp.ne.s32.totalorder %s5079_s14, %s4191_s15  ;;  %p4195_p5 = scmp.lt.u32.totalorder %s4191_s15, %s5079_s14 }
  0xeb   :  { %p4197_p6 = pnand %p4195_p5, %p4192_p4 }
  0xed   :  { %4200 = shalt.err (!%p4197_p6)
}
  0xee   :  { %s4201_s12 = scalar_lea.vmem %s155_s28, 16  ;;  %s4205_s20 = scalar_lea.vmem %s155_s28, 32 }
  0xef   :  { %p4202_p7 = scmp.ne.s32.totalorder %s155_s28, %s4201_s12  ;;  %p4206_p8 = scmp.lt.s32.totalorder %s155_s28, %s155_s28 }
  0xf0   :  { %p4207_p9 = scmp.lt.s32.totalorder %s4205_s20, %s4201_s12 }
  0xf2   :  { %p4208_p10 = por %p4207_p9, %p4206_p8 }
  0xf4   :  { %p4209_p11 = pnand %p4208_p10, %p4202_p7 }
  0xf6   :  { %4212 = shalt.err (!%p4209_p11)
}
  0xf7   :  { %157 = dma.hbm_to_vmem [thread:$0]  %s5079_s14, 16, %s155_s28, [#allocation18]  }
  0xf8   :  { %s4213_s25 = scalar_lea.hbm %s5081_s16, 16 }
  0xf9   :  { %p4214_p12 = scmp.ne.s32.totalorder %s5081_s16, %s4213_s25  ;;  %p4217_p13 = scmp.lt.u32.totalorder %s4213_s25, %s5081_s16 }
  0xfb   :  { %p4219_p0 = pnand %p4217_p13, %p4214_p12 }
  0xfd   :  { %4222 = shalt.err (!%p4219_p0)
}
  0xfe   :  { %s4223_s10 = scalar_lea.vmem %s177_s0, 16  ;;  %s4227_s29 = scalar_lea.vmem %s177_s0, 32 }
  0xff   :  { %p4224_p1 = scmp.ne.s32.totalorder %s177_s0, %s4223_s10  ;;  %p4228_p2 = scmp.lt.s32.totalorder %s177_s0, %s177_s0 }
 0x100   :  { %p4229_p3 = scmp.lt.s32.totalorder %s4227_s29, %s4223_s10 }
 0x102   :  { %p4230_p4 = por %p4229_p3, %p4228_p2 }
 0x104   :  { %p4231_p5 = pnand %p4230_p4, %p4224_p1 }
 0x106   :  { %4234 = shalt.err (!%p4231_p5)
}
 0x107   :  { %179 = dma.hbm_to_vmem [thread:$0]  %s5081_s16, 16, %s177_s0, [#allocation21]  }
 0x108   :  { %4257 = dma.done.wait [#allocation3], 256  }
 0x109   :  { %4258 = vsyncadd [#allocation3], 4294967040 }
 0x10a   :  { %4259 = dma.done.wait [#allocation6], 288  }
 0x10b   :  { %4260 = vsyncadd [#allocation6], 4294967008 }
 0x10c   :  { %4261 = dma.done.wait [#allocation9], 144  }
 0x10d   :  { %4262 = vsyncadd [#allocation9], 4294967152 }
 0x10e   :  { %4263 = dma.done.wait [#allocation12], 32  }
 0x10f   :  { %4264 = vsyncadd [#allocation12], 4294967264 }
 0x110   :  { %4265 = dma.done.wait [#allocation15], 32  }
 0x111   :  { %4266 = vsyncadd [#allocation15], 4294967264 }
 0x112   :  { %4267 = dma.done.wait [#allocation18], 32  }
 0x113   :  { %4268 = vsyncadd [#allocation18], 4294967264 }
 0x114   :  { %4269 = dma.done.wait [#allocation21], 528  }
 0x115   :  { %4270 = vsyncadd [#allocation21], 4294966768  ;;  %vm238_vm0 = vcmask 130048   ;;  %v229_v0 = vld [vmem:[#allocation7] sm:$0xff]  ;;  %v230_v1 = vld [vmem:[#allocation7 + $0x8] sm:$0xff]  ;;  %s5108_s2 = sld [smem:[#allocation37_spill]]  ;;  %v615_v51 = vlaneseq }
 0x116   :  { %v227_v2 = vld [vmem:[#allocation2] sm:$0xff]  ;;  %v3815_v3 = vpack.c.bf16 %v230_v1, %v229_v0  ;;  %v228_v4 = vld [vmem:[#allocation2 + $0x8] sm:$0xff]  ;;  %v506_v14 = vld [vmem:[%s5074_s9 + $0x10] sm:$0xff]  ;;  %vm336_vm1 = vcmask 261120   ;;  %s4291_s16 = smov 104   ;;  %s4292_s0 = smov 112  }
 0x117   :  { %3658 = vmatprep.mubr.msk.f32.mxu0 %vm238_vm0, %v227_v2  ;;  %v504_v8 = vld [vmem:[%s5074_s9] sm:$0xff]  ;;  %v505_v9 = vld [vmem:[%s5074_s9 + $0x8] sm:$0xff]  ;;  %v507_v15 = vld [vmem:[%s5074_s9 + $0x18] sm:$0xff]  ;;  %v4293_v47 = vmov 0.0   ;;  %vm4294_vm2 = vmmov 0   ;;  %v616_v56 = vshrl.u32 %v615_v51, 7 }
 0x118   :  { %3816 = vmatprep.subr.bf16.mxu0 %v3815_v3  ;;  %v3835_v10 = vpack.c.bf16 %v505_v9, %v504_v8  ;;  %v3839_v16 = vpack.c.bf16 %v507_v15, %v506_v14  ;;  %v418_v17 = vld [vmem:[%s5072_s7] sm:$0xff]  ;;  %v419_v18 = vld [vmem:[%s5072_s7 + $0x8] sm:$0xff]  ;;  %v420_v28 = vld [vmem:[%s5072_s7 + $0x10] sm:$0xff]  ;;  %v4295_v49 = vmov 1983009808   ;;  %vm1480_vm3 = vcmask 64512  }
 0x119   :  { %3818 = vmatpush3.bf16.msra.mxu0 %v3815_v3  ;;  %v3827_v19 = vpack.c.bf16 %v419_v18, %v418_v17  ;;  %v3511_v20 = vld [vmem:[#allocation8] ss:$0 sm:$0xff]  ;;  %v322_v26 = vld [vmem:[#allocation10] sm:$0xff]  ;;  %v421_v29 = vld [vmem:[%s5072_s7 + $0x18] sm:$0xff]  ;;  %s4290_s7 = smov 120   ;;  %v613_v50 = vunpack.c.l.s4 %v4295_v49  ;;  %vm3061_vm4 = vcmask 195584  }
 0x11a   :  { %3836 = vmatprep.subr.bf16.mxu1 %v3835_v10  ;;  %v3831_v32 = vpack.c.bf16 %v421_v29, %v420_v28  ;;  %v3520_v33 = vld [vmem:[#allocation14] ss:$0 sm:$0xff]  ;;  %v3514_v34 = vld [vmem:[#allocation11] ss:$0 sm:$0xff]  ;;  %v3517_v41 = vld [vmem:[#allocation13] ss:$0 sm:$0xff] }
 0x11b   :  { %v325_v5 = vld [vmem:[%s5108_s2] sm:$0xff]  ;;  %v326_v6 = vld [vmem:[%s5108_s2 + $0x8] sm:$0xff]  ;;  %v327_v11 = vld [vmem:[%s5108_s2 + $0x10] sm:$0xff]  ;;  %3838 = vmatpush3.bf16.msra.mxu1 %v3835_v10  ;;  %v4296_v53 = vmov 1934713408   ;;  %v614_v55 = vunpack.c.0.s8 %v613_v50  ;;  %vm3327_vm9 = vcmask 523264  }
 0x11c   :  { %3659 = vmatmul.mubr.msk.f32.vlgmr.msra.gmra.mrb[0].mxu0 %vm238_vm0, %v228_v4  ;;  %v3819_v7 = vpack.c.bf16 %v326_v6, %v325_v5  ;;  %v328_v12 = vld [vmem:[%s5108_s2 + $0x18] sm:$0xff]  ;;  %3840 = vmatprep.subr.bf16.mxu1 %v3839_v16  ;;  %v645_v54 = vunpack.c.l.s4 %v4296_v53  ;;  %s4297_s2 = smov 24   ;;  %s5110_s5 = sld [smem:[#allocation39_spill]]  ;;  %vm3485_vm14 = vcmask 1041409   ;;  %vm3488_vm15 = vcmask 254976  }
 0x11d   :  { %v3823_v13 = vpack.c.bf16 %v328_v12, %v327_v11  ;;  %v4669_v60 = vsub.s32 %v614_v55, %v616_v56  ;;  %s4298_s15 = smov [#allocation23]  }
 0x11e   :  { %3820 = vmatprep.subr.bf16.mxu0 %v3819_v7  ;;  %v646_v59 = vunpack.c.0.s8 %v645_v54  ;;  %s3496_s30 = sshll.u32 %s4298_s15, 4  ;;  %s3497_s30 = int_to_ptr.vmem [resolvable:$true] %s3496_s30 }
 0x11f   :  { %3822 = vmatpush3.bf16.msra.mxu0 %v3819_v7  ;;  %3842 = vmatpush3.bf16.msra.mxu1 %v3839_v16  ;;  %s4235_s4 = scalar_lea.vmem %s3497_s30, 32  ;;  %p4240_p7 = scmp.lt.s32.totalorder %s3497_s30, %s3497_s30 }
 0x120   :  { %3824 = vmatprep.subr.bf16.mxu0 %v3823_v13  ;;  %3704 = vmatprep.subr.mxu1 %v4293_v47  ;;  %v4671_v3 = vsub.s32 %v646_v59, %v616_v56  ;;  %p4236_p6 = scmp.ne.s32.totalorder %s3497_s30, %s4235_s4  ;;  %p4241_p8 = scmp.lt.s32.totalorder %s4235_s4, %s4235_s4 }
 0x122   :  { %p4242_p9 = por %p4241_p8, %p4240_p7 }
 0x123   :  { %3826 = vmatpush3.bf16.msra.mxu0 %v3823_v13 }
 0x124   :  { %3828 = vmatprep.subr.bf16.mxu0 %v3827_v19  ;;  %p4243_p10 = pnand %p4242_p9, %p4236_p6 }
 0x1ef   :  { %v3660_v21 = vpop.f32.mrb[0].mxu0 }
 0x1f0   :  { %v317_v22 = vadd.f32 %v3660_v21, %v3511_v20  ;;  %v311_v23 = vpop.f32.mrb[1].mxu0 }
 0x1f1   :  { %v312_v24 = vadd.f32 %v3511_v20, %v311_v23 }
 0x1f2   :  { %v321_v25 = vmul.f32 5.656854, %v317_v22 }
 0x1f3   :  { %v320_v27 = vmul.f32 5.656854, %v312_v24 }
 0x1f4   :  { %v4616_v31 = vadd.f32 %v322_v26, %v321_v25 }
 0x1f5   :  { %v4614_v30 = vadd.f32 %v322_v26, %v320_v27 }
 0x1f7   :  { %3669 = vmatprep.mubr.msk.f32.mxu0 %vm336_vm1, %v4614_v30  ;;  %3691 = vmatprep.mubr.msk.f32.mxu1 %vm336_vm1, %v4614_v30 }
 0x1f8   :  { %3670 = vmatmul.mubr.msk.f32.vlgmr.msra.gmra.mrb[2].mxu0 %vm336_vm1, %v4616_v31  ;;  %3692 = vmatmul.mubr.msk.f32.vlgmr.msra.gmra.mrb[0].mxu1 %vm336_vm1, %v4616_v31 }
 0x1f9   :  { %3830 = vmatpush3.bf16.msra.mxu0 %v3827_v19  ;;  %3680 = vmatprep.mubr.msk.f32.mxu0 %vm336_vm1, %v4614_v30 }
 0x1fa   :  { %3832 = vmatprep.subr.bf16.mxu0 %v3831_v32  ;;  %3706 = vmatprep.mubr.msk.f32.mxu1 %vm4294_vm2, %v4293_v47 }
 0x1fd   :  { %3834 = vmatpush3.bf16.msra.mxu0 %v3831_v32 }
 0x1fe   :  { %3694 = vmatprep.subr.mxu0 %v4293_v47 }
 0x200   :  { %3681 = vmatmul.mubr.msk.f32.vlgmr.msra.gmra.mrb[4].mxu0 %vm336_vm1, %v4616_v31 }
 0x201   :  { %3696 = vmatprep.mubr.msk.f32.mxu0 %vm4294_vm2, %v4293_v47 }
 0x2cb   :  { %v3671_v35 = vpop.f32.mrb[2].mxu0  ;;  %v3693_v36 = vpop.f32.mrb[0].mxu1 }
 0x2cc   :  { %v4630_v37 = vadd.f32 %v3693_v36, %v3520_v33  ;;  %v409_v38 = vpop.f32.mrb[3].mxu0  ;;  %v581_v39 = vpop.f32.mrb[1].mxu1  ;;  %v4647_v46 = vadd.f32 %v3671_v35, %v3514_v34 }
 0x2cd   :  { %v4632_v40 = vadd.f32 %v3514_v34, %v409_v38  ;;  %v4659_v48 = vadd.f32 %v3520_v33, %v581_v39 }
 0x2cf   :  { %592 = vrot.lane.b32.xlu1 %v4632_v40, %s4290_s7 }
 0x2d3   :  { %v3682_v42 = vpop.f32.mrb[4].mxu0 }
 0x2d4   :  { %v495_v43 = vpop.f32.mrb[5].mxu0  ;;  %v4641_v45 = vadd.f32 %v3682_v42, %v3517_v41 }
 0x2d5   :  { %v496_v44 = vadd.f32 %v3517_v41, %v495_v43 }
 0x2d7   :  { %884 = vrot.lane.b32.xlu0 %v496_v44, %s4290_s7  ;;  %896 = vrot.lane.b32.xlu1 %v496_v44, %s4291_s16 }
 0x2db   :  { %890 = vrot.lane.b32.xlu0 %v496_v44, %s4292_s0  ;;  %604 = vrot.lane.b32.xlu1 %v4632_v40, %s4291_s16 }
 0x2df   :  { %598 = vrot.lane.b32.xlu0 %v4632_v40, %s4292_s0  ;;  %892 = vrot.lane.b32.xlu1 %v4641_v45, %s4292_s0 }
 0x2e3   :  { %886 = vrot.lane.b32.xlu0 %v4641_v45, %s4290_s7  ;;  %594 = vrot.lane.b32.xlu1 %v4647_v46, %s4290_s7 }
 0x2e7   :  { %898 = vrot.lane.b32.xlu0 %v4641_v45, %s4291_s16  ;;  %606 = vrot.lane.b32.xlu1 %v4647_v46, %s4291_s16 }
 0x2eb   :  { %600 = vrot.lane.b32.xlu0 %v4647_v46, %s4292_s0  ;;  %1176 = vrot.lane.b32.xlu1 %v4659_v48, %s4290_s7 }
 0x341   :  { %v593_v52 = vpop.permute.xlu1 %592 }
 0x349   :  { %v885_v57 = vpop.permute.xlu0 %884  ;;  %v897_v58 = vpop.permute.xlu1 %896 }
 0x34a   :  { %v918_v61 = vcombine.low %v885_v57, %v897_v58  ;;  %v919_v62 = vcombine.high %v885_v57, %v897_v58 }
 0x34c   :  { %v926_v6 = vrot.slane %v918_v61, %v4669_v60  ;;  %v933_v7 = vrot.slane %v919_v62, %v4669_v60 }
 0x34d   :  { %v891_v63 = vpop.permute.xlu0 %890  ;;  %v605_v0 = vpop.permute.xlu1 %604 }
 0x34e   :  { %v902_v1 = vcombine.low %v496_v44, %v891_v63  ;;  %v903_v2 = vcombine.high %v496_v44, %v891_v63  ;;  %v626_v4 = vcombine.low %v593_v52, %v605_v0  ;;  %v627_v5 = vcombine.high %v593_v52, %v605_v0 }
 0x350   :  { %v910_v8 = vrot.slane %v902_v1, %v4669_v60  ;;  %v917_v9 = vrot.slane %v903_v2, %v4669_v60  ;;  %v634_v16 = vrot.slane %v626_v4, %v4669_v60  ;;  %v641_v17 = vrot.slane %v627_v5, %v4669_v60 }
 0x351   :  { %v599_v10 = vpop.permute.xlu0 %598  ;;  %v893_v11 = vpop.permute.xlu1 %892 }
 0x352   :  { %v934_v12 = vcombine.low %v910_v8, %v926_v6  ;;  %v935_v13 = vcombine.high %v910_v8, %v926_v6  ;;  %v950_v14 = vcombine.low %v917_v9, %v933_v7  ;;  %v951_v15 = vcombine.high %v917_v9, %v933_v7 }
 0x353   :  { %v610_v18 = vcombine.low %v4632_v40, %v599_v10  ;;  %v611_v19 = vcombine.high %v4632_v40, %v599_v10  ;;  %v970_v26 = vcombine.low %v4641_v45, %v893_v11  ;;  %v971_v27 = vcombine.high %v4641_v45, %v893_v11 }
 0x354   :  { %v942_v20 = vrot.slane %v934_v12, %v4671_v3  ;;  %v949_v21 = vrot.slane %v935_v13, %v4671_v3  ;;  %v958_v22 = vrot.slane %v950_v14, %v4671_v3  ;;  %v965_v23 = vrot.slane %v951_v15, %v4671_v3 }
 0x355   :  { %v618_v24 = vrot.slane %v610_v18, %v4669_v60  ;;  %v625_v25 = vrot.slane %v611_v19, %v4669_v60  ;;  %v887_v28 = vpop.permute.xlu0 %886  ;;  %v595_v29 = vpop.permute.xlu1 %594  ;;  %v978_v55 = vrot.slane %v970_v26, %v4669_v60  ;;  %v985_v56 = vrot.slane %v971_v27, %v4669_v60 }
 0x356   :  { %v1038_v32 = vcombine.low %v942_v20, %v949_v21  ;;  %v3527_v33 = vcombine.high %v942_v20, %v949_v21  ;;  %v1054_v34 = vcombine.low %v958_v22, %v965_v23  ;;  %v3528_v35 = vcombine.high %v958_v22, %v965_v23 }
 0x357   :  { %v642_v36 = vcombine.low %v618_v24, %v634_v16  ;;  %v643_v38 = vcombine.high %v618_v24, %v634_v16  ;;  %v658_v39 = vcombine.low %v625_v25, %v641_v17  ;;  %v659_v40 = vcombine.high %v625_v25, %v641_v17 }
 0x358   :  { %v4690_v41 = vrot.slane %v1038_v32, %v4669_v60  ;;  %v4693_v42 = vrot.slane %v3527_v33, %v4669_v60  ;;  %v4696_v43 = vrot.slane %v1054_v34, %v4669_v60  ;;  %v4699_v44 = vrot.slane %v3528_v35, %v4669_v60 }
 0x359   :  { %v650_v45 = vrot.slane %v642_v36, %v4671_v3  ;;  %v657_v49 = vrot.slane %v643_v38, %v4671_v3  ;;  %v666_v50 = vrot.slane %v658_v39, %v4671_v3  ;;  %v673_v51 = vrot.slane %v659_v40, %v4671_v3  ;;  %v899_v52 = vpop.permute.xlu0 %898  ;;  %v607_v53 = vpop.permute.xlu1 %606 }
 0x35a   :  { %v1070_v54 = vcombine.low %v4690_v41, %v4693_v42  ;;  %v986_v62 = vcombine.low %v887_v28, %v899_v52  ;;  %v987_v63 = vcombine.high %v887_v28, %v899_v52  ;;  %v694_v0 = vcombine.low %v595_v29, %v607_v53 }
 0x35b   :  { %v746_v57 = vcombine.low %v650_v45, %v657_v49  ;;  %v3523_v58 = vcombine.high %v650_v45, %v657_v49  ;;  %v762_v59 = vcombine.low %v666_v50, %v673_v51  ;;  %v3524_v61 = vcombine.high %v666_v50, %v673_v51 }
 0x35c   :  { %v695_v1 = vcombine.high %v595_v29, %v607_v53  ;;  %v1071_v2 = vcombine.high %v4690_v41, %v4693_v42  ;;  %v1086_v4 = vcombine.low %v4696_v43, %v4699_v44  ;;  %v1087_v7 = vcombine.high %v4696_v43, %v4699_v44 }
 0x35d   :  { %v4714_v5 = vrot.slane %v746_v57, %v4669_v60  ;;  %v4717_v6 = vrot.slane %v3523_v58, %v4669_v60  ;;  %v769_v8 = vrot.slane %v762_v59, %v4669_v60  ;;  %v994_v9 = vrot.slane %v986_v62, %v4669_v60  ;;  %v601_v11 = vpop.permute.xlu0 %600 }
 0x35e   :  { %v1001_v10 = vrot.slane %v987_v63, %v4669_v60  ;;  %v777_v12 = vrot.slane %v3524_v61, %v4669_v60  ;;  %v702_v14 = vrot.slane %v694_v0, %v4669_v60  ;;  %v709_v15 = vrot.slane %v695_v1, %v4669_v60 }
 0x35f   :  { %v778_v13 = vcombine.low %v4714_v5, %v4717_v6  ;;  %v1002_v16 = vcombine.low %v978_v55, %v994_v9  ;;  %v1003_v17 = vcombine.high %v978_v55, %v994_v9  ;;  %v678_v20 = vcombine.low %v4647_v46, %v601_v11 }
 0x360   :  { %v1018_v18 = vcombine.low %v985_v56, %v1001_v10  ;;  %v1019_v19 = vcombine.high %v985_v56, %v1001_v10  ;;  %v679_v21 = vcombine.high %v4647_v46, %v601_v11  ;;  %v1078_v22 = vrot.slane %v1070_v54, %v4671_v3 }
 0x361   :  { %v1094_v23 = vrot.slane %v1086_v4, %v4671_v3  ;;  %v1010_v24 = vrot.slane %v1002_v16, %v4671_v3  ;;  %v1017_v25 = vrot.slane %v1003_v17, %v4671_v3  ;;  %v794_v28 = vcombine.low %v769_v8, %v777_v12 }
 0x362   :  { %v1026_v26 = vrot.slane %v1018_v18, %v4671_v3  ;;  %v1033_v27 = vrot.slane %v1019_v19, %v4671_v3  ;;  %v686_v29 = vrot.slane %v678_v20, %v4669_v60  ;;  %v693_v32 = vrot.slane %v679_v21, %v4669_v60 }
 0x363   :  { %v1102_v33 = vcombine.low %v1078_v22, %v1094_v23  ;;  %v1106_v34 = vcombine.low %v1010_v24, %v1017_v25  ;;  %v3529_v46 = vcombine.high %v1010_v24, %v1017_v25  ;;  %v779_v53 = vcombine.high %v4714_v5, %v4717_v6 }
 0x364   :  { %v1122_v35 = vcombine.low %v1026_v26, %v1033_v27  ;;  %v3530_v36 = vcombine.high %v1026_v26, %v1033_v27  ;;  %v710_v38 = vcombine.low %v686_v29, %v702_v14  ;;  %v711_v39 = vcombine.high %v686_v29, %v702_v14 }
 0x365   :  { %v726_v40 = vcombine.low %v693_v32, %v709_v15  ;;  %v727_v41 = vcombine.high %v693_v32, %v709_v15  ;;  %3695 = vmatpush3.xpose.msk.msra.mxu0 %vm1480_vm3, %v1102_v33  ;;  %v1113_v42 = vrot.slane %v1106_v34, %v4669_v60  ;;  %v1121_v43 = vrot.slane %v3529_v46, %v4669_v60 }
 0x366   :  { %v1129_v44 = vrot.slane %v1122_v35, %v4669_v60  ;;  %v1137_v45 = vrot.slane %v3530_v36, %v4669_v60  ;;  %3699 = vmatprep.subr.mxu0 %v4293_v47  ;;  %v718_v49 = vrot.slane %v710_v38, %v4671_v3  ;;  %v725_v50 = vrot.slane %v711_v39, %v4671_v3 }
 0x367   :  { %v734_v51 = vrot.slane %v726_v40, %v4671_v3  ;;  %v741_v52 = vrot.slane %v727_v41, %v4671_v3  ;;  %v795_v54 = vcombine.high %v769_v8, %v777_v12  ;;  %v1138_v55 = vcombine.low %v1113_v42, %v1121_v43  ;;  %v3535_v40 = vld [vmem:[#allocation5] ss:$0 sm:$0xff] }
 0x368   :  { %v1085_v56 = vrot.slane %v1071_v2, %v4671_v3  ;;  %v814_v57 = vcombine.low %v718_v49, %v725_v50  ;;  %v3525_v58 = vcombine.high %v718_v49, %v725_v50  ;;  %v1154_v62 = vcombine.low %v1129_v44, %v1137_v45 }
 0x369   :  { %v830_v59 = vcombine.low %v734_v51, %v741_v52  ;;  %v3526_v61 = vcombine.high %v734_v51, %v741_v52  ;;  %v1101_v63 = vrot.slane %v1087_v7, %v4671_v3  ;;  %v786_v0 = vrot.slane %v778_v13, %v4671_v3 }
 0x36a   :  { %v802_v1 = vrot.slane %v794_v28, %v4671_v3  ;;  %v821_v4 = vrot.slane %v814_v57, %v4669_v60  ;;  %v829_v9 = vrot.slane %v3525_v58, %v4669_v60  ;;  %v793_v10 = vrot.slane %v779_v53, %v4671_v3  ;;  %v3536_v57 = vld [vmem:[#allocation5 + $0x1] ss:$0 sm:$0xff] }
 0x36b   :  { %v837_v5 = vrot.slane %v830_v59, %v4669_v60  ;;  %v845_v6 = vrot.slane %v3526_v61, %v4669_v60  ;;  %v1104_v2 = vcombine.low %v1085_v56, %v1101_v63  ;;  %v809_v11 = vrot.slane %v795_v54, %v4671_v3 }
 0x36c   :  { %v810_v8 = vcombine.low %v786_v0, %v802_v1  ;;  %v846_v12 = vcombine.low %v821_v4, %v829_v9  ;;  %v1103_v14 = vcombine.high %v1078_v22, %v1094_v23  ;;  %v1139_v13 = vcombine.high %v1113_v42, %v1121_v43 }
 0x36d   :  { %v862_v7 = vcombine.low %v837_v5, %v845_v6  ;;  %3705 = vmatpush3.xpose.msk.msra.mxu1 %vm1480_vm3, %v1104_v2  ;;  %v812_v15 = vcombine.low %v793_v10, %v809_v11  ;;  %v1155_v16 = vcombine.high %v1129_v44, %v1137_v45  ;;  %v1146_v17 = vrot.slane %v1138_v55, %v4671_v3 }
 0x36e   :  { %3697 = vmatmul.mubr.msk.f32.vlgmr.msra.gmra.mrb[6].mxu0 %vm1480_vm3, %v810_v8  ;;  %v1162_v18 = vrot.slane %v1154_v62, %v4671_v3  ;;  %v811_v19 = vcombine.high %v786_v0, %v802_v1  ;;  %3714 = vmatprep.subr.mxu1 %v4293_v47  ;;  %v854_v20 = vrot.slane %v846_v12, %v4671_v3 }
 0x36f   :  { %3700 = vmatpush3.xpose.msk.msra.mxu0 %vm1480_vm3, %v1103_v14  ;;  %3701 = vmatprep.mubr.msk.f32.mxu0 %vm4294_vm2, %v4293_v47  ;;  %v870_v21 = vrot.slane %v862_v7, %v4671_v3  ;;  %v1105_v22 = vcombine.high %v1085_v56, %v1101_v63  ;;  %v847_v24 = vcombine.high %v821_v4, %v829_v9 }
 0x370   :  { %3709 = vmatprep.subr.mxu0 %v4293_v47  ;;  %3707 = vmatmul.mubr.msk.f32.vlgmr.msra.gmra.mrb[2].mxu1 %vm1480_vm3, %v812_v15  ;;  %v1170_v23 = vcombine.low %v1146_v17, %v1162_v18  ;;  %v863_v25 = vcombine.high %v837_v5, %v845_v6  ;;  %v1171_v26 = vcombine.high %v1146_v17, %v1162_v18  ;;  %v1177_v15 = vpop.permute.xlu1 %1176 }
 0x371   :  { %3716 = vmatprep.mubr.msk.f32.mxu1 %vm4294_vm2, %v4293_v47  ;;  %v1153_v27 = vrot.slane %v1139_v13, %v4671_v3  ;;  %v1169_v28 = vrot.slane %v1155_v16, %v4671_v3  ;;  %v813_v29 = vcombine.high %v793_v10, %v809_v11  ;;  %v878_v32 = vcombine.low %v854_v20, %v870_v21 }
 0x372   :  { %3702 = vmatmul.mubr.msk.f32.vlgmr.msra.gmra.mrb[8].mxu0 %vm1480_vm3, %v811_v19  ;;  %3715 = vmatpush3.xpose.msk.msra.mxu1 %vm1480_vm3, %v1170_v23  ;;  %v879_v33 = vcombine.high %v854_v20, %v870_v21  ;;  %v861_v34 = vrot.slane %v847_v24, %v4671_v3  ;;  %v877_v46 = vrot.slane %v863_v25, %v4671_v3 }
 0x373   :  { %3710 = vmatpush3.xpose.msk.msra.mxu0 %vm1480_vm3, %v1105_v22  ;;  %3711 = vmatprep.mubr.msk.f32.mxu0 %vm4294_vm2, %v4293_v47  ;;  %v1172_v35 = vcombine.low %v1153_v27, %v1169_v28  ;;  %v1173_v36 = vcombine.high %v1153_v27, %v1169_v28 }
 0x374   :  { %3719 = vmatprep.subr.mxu0 %v4293_v47  ;;  %3724 = vmatprep.subr.mxu1 %v4293_v47  ;;  %v880_v38 = vcombine.low %v861_v34, %v877_v46  ;;  %v881_v39 = vcombine.high %v861_v34, %v877_v46 }
 0x375   :  { %3717 = vmatmul.mubr.msk.f32.vlgmr.msra.gmra.mrb[4].mxu1 %vm1480_vm3, %v878_v32 }
 0x376   :  { %3712 = vmatmul.mubr.msk.f32.vlgmr.msra.gmra.mrb[10].mxu0 %vm1480_vm3, %v813_v29  ;;  %3725 = vmatpush3.xpose.msk.msra.mxu1 %vm1480_vm3, %v1172_v35 }
 0x377   :  { %3720 = vmatpush3.xpose.msk.msra.mxu0 %vm1480_vm3, %v1171_v26  ;;  %3721 = vmatprep.mubr.msk.f32.mxu0 %vm4294_vm2, %v4293_v47 }
 0x378   :  { %3729 = vmatprep.subr.mxu0 %v4293_v47  ;;  %3726 = vmatprep.mubr.msk.f32.mxu1 %vm4294_vm2, %v4293_v47 }
 0x379   :  { %3734 = vmatprep.subr.mxu1 %v4293_v47  ;;  %3727 = vmatmul.mubr.msk.f32.vlgmr.msra.gmra.mrb[6].mxu1 %vm1480_vm3, %v880_v38 }
 0x37a   :  { %3722 = vmatmul.mubr.msk.f32.vlgmr.msra.gmra.mrb[12].mxu0 %vm1480_vm3, %v879_v33  ;;  %3736 = vmatprep.mubr.msk.f32.mxu1 %vm4294_vm2, %v4293_v47 }
 0x37b   :  { %3730 = vmatpush3.xpose.msk.msra.mxu0 %vm1480_vm3, %v1173_v36  ;;  %3731 = vmatprep.mubr.msk.f32.mxu0 %vm4294_vm2, %v4293_v47 }
 0x37c   :  { %3739 = vmatprep.subr.mxu0 %v4293_v47 }
 0x37e   :  { %3732 = vmatmul.mubr.msk.f32.vlgmr.msra.gmra.mrb[14].mxu0 %vm1480_vm3, %v881_v39 }
 0x37f   :  { %3741 = vmatprep.mubr.msk.f32.mxu0 %vm4294_vm2, %v4293_v47 }
 0x441   :  { %v1553_v41 = vpop.f32.mrb[6].mxu0 }
 0x442   :  { %v1554_v42 = vadd.f32 %v3535_v40, %v1553_v41  ;;  %v3698_v43 = vpop.f32.mrb[7].mxu0 }
 0x443   :  { %v1705_v44 = vpop.f32.mrb[2].mxu1 }
 0x444   :  { %v2089_v45 = vsel %vm1480_vm3, %v1554_v42, -inf  ;;  %v1706_v49 = vadd.f32 %v3535_v40, %v1705_v44  ;;  %v3708_v50 = vpop.f32.mrb[3].mxu1 }
 0x445   :  { %2090 = vmax.xlane.f32.xlu0 %v2089_v45  ;;  %v1629_v51 = vpop.f32.mrb[8].mxu0 }
 0x446   :  { %v1630_v52 = vadd.f32 %v3535_v40, %v1629_v51  ;;  %v3703_v53 = vpop.f32.mrb[9].mxu0  ;;  %v2095_v54 = vsel %vm1480_vm3, %v1706_v49, -inf }
 0x448   :  { %v2092_v55 = vsel %vm1480_vm3, %v1630_v52, -inf  ;;  %v1857_v61 = vpop.f32.mrb[4].mxu1 }
 0x449   :  { %2096 = vmax.xlane.f32.xlu0 %v2095_v54  ;;  %2093 = vmax.xlane.f32.xlu1 %v2092_v55  ;;  %v1781_v56 = vpop.f32.mrb[10].mxu0  ;;  %v1858_v63 = vadd.f32 %v3536_v57, %v1857_v61  ;;  %v3718_v0 = vpop.f32.mrb[5].mxu1 }
 0x44a   :  { %v1782_v58 = vadd.f32 %v3535_v40, %v1781_v56  ;;  %v3713_v59 = vpop.f32.mrb[11].mxu0 }
 0x44b   :  { %v2101_v5 = vsel %vm1480_vm3, %v1858_v63, -inf }
 0x44c   :  { %v2098_v62 = vsel %vm1480_vm3, %v1782_v58, -inf  ;;  %v2009_v6 = vpop.f32.mrb[6].mxu1 }
 0x44d   :  { %2099 = vmax.xlane.f32.xlu0 %v2098_v62  ;;  %v1933_v1 = vpop.f32.mrb[12].mxu0  ;;  %2102 = vmax.xlane.f32.xlu1 %v2101_v5  ;;  %v2010_v8 = vadd.f32 %v3536_v57, %v2009_v6  ;;  %v3728_v10 = vpop.f32.mrb[7].mxu1 }
 0x44e   :  { %v1934_v4 = vadd.f32 %v3536_v57, %v1933_v1  ;;  %v3723_v9 = vpop.f32.mrb[13].mxu0 }
 0x44f   :  { %v2107_v14 = vsel %vm1480_vm3, %v2010_v8, -inf }
 0x450   :  { %v2104_v2 = vsel %vm1480_vm3, %v1934_v4, -inf }
 0x451   :  { %2105 = vmax.xlane.f32.xlu0 %v2104_v2  ;;  %v2085_v11 = vpop.f32.mrb[14].mxu0  ;;  %2108 = vmax.xlane.f32.xlu1 %v2107_v14 }
 0x452   :  { %v4813_v12 = vadd.f32 %v3536_v57, %v2085_v11  ;;  %v3733_v7 = vpop.f32.mrb[15].mxu0 }
 0x454   :  { %v2110_v13 = vsel %vm1480_vm3, %v4813_v12, -inf }
 0x455   :  { %2111 = vmax.xlane.f32.xlu0 %v2110_v13 }
 0x462   :  { %1188 = vrot.lane.b32.xlu1 %v4659_v48, %s4291_s16 }
 0x46b   :  { %1182 = vrot.lane.b32.xlu0 %v4659_v48, %s4292_s0 }
 0x4d2   :  { %v2091_v16 = vpop.xlane.xlu0 %2090 }
 0x4d3   :  { %v2113_v17 = vsub.f32 %v1554_v42, %v2091_v16 }
 0x4d5   :  { %v2121_v18 = vmul.f32 1.442695, %v2113_v17 }
 0x4d6   :  { %v2097_v19 = vpop.xlane.xlu0 %2096  ;;  %v2094_v20 = vpop.xlane.xlu1 %2093 }
 0x4d7   :  { %3901 = vpow2.f32 %v2121_v18  ;;  %v2115_v21 = vsub.f32 %v1706_v49, %v2097_v19  ;;  %v2114_v22 = vsub.f32 %v1630_v52, %v2094_v20 }
 0x4d9   :  { %v2125_v23 = vmul.f32 1.442695, %v2115_v21  ;;  %v2123_v24 = vmul.f32 1.442695, %v2114_v22 }
 0x4da   :  { %v2100_v25 = vpop.xlane.xlu0 %2099  ;;  %v2103_v27 = vpop.xlane.xlu1 %2102 }
 0x4db   :  { %3903 = vpow2.f32 %v2125_v23  ;;  %v2116_v26 = vsub.f32 %v1782_v58, %v2100_v25  ;;  %v2117_v29 = vsub.f32 %v1858_v63, %v2103_v27 }
 0x4dc   :  { %3905 = vpow2.f32 %v2123_v24 }
 0x4dd   :  { %v2127_v28 = vmul.f32 1.442695, %v2116_v26  ;;  %v2129_v34 = vmul.f32 1.442695, %v2117_v29 }
 0x4de   :  { %v2106_v32 = vpop.xlane.xlu0 %2105  ;;  %v2109_v46 = vpop.xlane.xlu1 %2108 }
 0x4df   :  { %3907 = vpow2.f32 %v2127_v28  ;;  %v2118_v33 = vsub.f32 %v1934_v4, %v2106_v32  ;;  %v2119_v36 = vsub.f32 %v2010_v8, %v2109_v46 }
 0x4e0   :  { %3909 = vpow2.f32 %v2129_v34 }
 0x4e1   :  { %v4822_v35 = vpop.eup %3901  ;;  %v2131_v40 = vmul.f32 1.442695, %v2118_v33  ;;  %v2133_v41 = vmul.f32 1.442695, %v2119_v36 }
 0x4e2   :  { %v4824_v38 = vpop.xlane.xlu0 %2111  ;;  %v2137_v39 = vsel %vm1480_vm3, %v4822_v35, 0.0  ;;  %v1189_v42 = vpop.permute.xlu1 %1188 }
 0x4e3   :  { %2138 = vadd.xlane.f32.xlu1 %v2137_v39  ;;  %3911 = vpow2.f32 %v2133_v41  ;;  %v1210_v44 = vcombine.low %v1177_v15, %v1189_v42  ;;  %v1211_v45 = vcombine.high %v1177_v15, %v1189_v42  ;;  %v2120_v46 = vsub.f32 %v4813_v12, %v4824_v38 }
 0x4e4   :  { %3913 = vpow2.f32 %v2131_v40 }
 0x4e5   :  { %v4828_v43 = vpop.eup %3903  ;;  %v1218_v54 = vrot.slane %v1210_v44, %v4669_v60  ;;  %v1225_v55 = vrot.slane %v1211_v45, %v4669_v60  ;;  %v2135_v36 = vmul.f32 1.442695, %v2120_v46 }
 0x4e6   :  { %v4830_v49 = vpop.eup %3905  ;;  %v1183_v50 = vpop.permute.xlu0 %1182  ;;  %v2143_v51 = vsel %vm1480_vm3, %v4828_v43, 0.0 }
 0x4e7   :  { %v1194_v52 = vcombine.low %v4659_v48, %v1183_v50  ;;  %v1195_v53 = vcombine.high %v4659_v48, %v1183_v50  ;;  %2144 = vadd.xlane.f32.xlu1 %v2143_v51  ;;  %v2140_v56 = vsel %vm1480_vm3, %v4830_v49, 0.0  ;;  %3915 = vpow2.f32 %v2135_v36 }
 0x4e8   :  { %2141 = vadd.xlane.f32.xlu0 %v2140_v56 }
 0x4e9   :  { %v4840_v57 = vpop.eup %3907  ;;  %v1202_v58 = vrot.slane %v1194_v52, %v4669_v60  ;;  %v1209_v59 = vrot.slane %v1195_v53, %v4669_v60 }
 0x4ea   :  { %v2146_v61 = vsel %vm1480_vm3, %v4840_v57, 0.0  ;;  %v4846_v62 = vpop.eup %3909 }
 0x4eb   :  { %v1226_v48 = vcombine.low %v1202_v58, %v1218_v54  ;;  %v1227_v63 = vcombine.high %v1202_v58, %v1218_v54  ;;  %v1242_v0 = vcombine.low %v1209_v59, %v1225_v55  ;;  %v1243_v1 = vcombine.high %v1209_v59, %v1225_v55 }
 0x4ec   :  { %v2149_v4 = vsel %vm1480_vm3, %v4846_v62, 0.0  ;;  %2147 = vadd.xlane.f32.xlu0 %v2146_v61 }
 0x4ed   :  { %v1234_v9 = vrot.slane %v1226_v48, %v4671_v3  ;;  %v1241_v5 = vrot.slane %v1227_v63, %v4671_v3  ;;  %v1250_v6 = vrot.slane %v1242_v0, %v4671_v3  ;;  %v1257_v2 = vrot.slane %v1243_v1, %v4671_v3  ;;  %2150 = vadd.xlane.f32.xlu1 %v2149_v4  ;;  %v4854_v8 = vpop.eup %3911 }
 0x4ee   :  { %v2155_v13 = vsel %vm1480_vm3, %v4854_v8, 0.0  ;;  %v4858_v15 = vpop.eup %3913 }
 0x4ef   :  { %v1330_v10 = vcombine.low %v1234_v9, %v1241_v5  ;;  %v3531_v11 = vcombine.high %v1234_v9, %v1241_v5  ;;  %v1346_v7 = vcombine.low %v1250_v6, %v1257_v2  ;;  %v3532_v14 = vcombine.high %v1250_v6, %v1257_v2 }
 0x4f0   :  { %2156 = vadd.xlane.f32.xlu0 %v2155_v13  ;;  %v2152_v24 = vsel %vm1480_vm3, %v4858_v15, 0.0 }
 0x4f1   :  { %v1337_v16 = vrot.slane %v1330_v10, %v4669_v60  ;;  %v1345_v17 = vrot.slane %v3531_v11, %v4669_v60  ;;  %v1353_v18 = vrot.slane %v1346_v7, %v4669_v60  ;;  %v1361_v19 = vrot.slane %v3532_v14, %v4669_v60  ;;  %v4878_v39 = vpop.eup %3915 }
 0x4f2   :  { %v2158_v40 = vsel %vm1480_vm3, %v4878_v39, 0.0 }
 0x4f3   :  { %v1362_v20 = vcombine.low %v1337_v16, %v1345_v17  ;;  %v1378_v21 = vcombine.low %v1353_v18, %v1361_v19  ;;  %v1363_v22 = vcombine.high %v1337_v16, %v1345_v17  ;;  %v1379_v23 = vcombine.high %v1353_v18, %v1361_v19 }
 0x4f4   :  { %2153 = vadd.xlane.f32.xlu0 %v2152_v24 }
 0x4f5   :  { %v1370_v25 = vrot.slane %v1362_v20, %v4671_v3  ;;  %v1386_v26 = vrot.slane %v1378_v21, %v4671_v3  ;;  %v1377_v27 = vrot.slane %v1363_v22, %v4671_v3  ;;  %v1393_v28 = vrot.slane %v1379_v23, %v4671_v3 }
 0x4f7   :  { %v1394_v29 = vcombine.low %v1370_v25, %v1386_v26  ;;  %v1395_v32 = vcombine.high %v1370_v25, %v1386_v26  ;;  %v1396_v33 = vcombine.low %v1377_v27, %v1393_v28  ;;  %v1397_v34 = vcombine.high %v1377_v27, %v1393_v28 }
 0x4f9   :  { %3735 = vmatpush3.msra.mxu1 %v1394_v29  ;;  %3740 = vmatpush3.msra.mxu0 %v1395_v32 }
 0x4fa   :  { %3744 = vmatprep.subr.mxu1 %v4293_v47  ;;  %3749 = vmatprep.subr.mxu0 %v4293_v47 }
 0x4fe   :  { %1184 = vrot.lane.b32.xlu1 %v4630_v37, %s4292_s0 }
 0x50a   :  { %1178 = vrot.lane.b32.xlu0 %v4630_v37, %s4290_s7 }
 0x522   :  { %2159 = vadd.xlane.f32.xlu1 %v2158_v40 }
 0x533   :  { %1190 = vrot.lane.b32.xlu1 %v4630_v37, %s4291_s16  ;;  %s5109_s16 = sld [smem:[#allocation38_spill]] }
 0x570   :  { %v2139_v41 = vpop.xlane.xlu1 %2138 }
 0x571   :  { %3917 = vrcp.f32 %v2139_v41 }
 0x574   :  { %v2145_v42 = vpop.xlane.xlu1 %2144 }
 0x575   :  { %3919 = vrcp.f32 %v2145_v42  ;;  %v2142_v44 = vpop.xlane.xlu0 %2141 }
 0x576   :  { %3921 = vrcp.f32 %v2142_v44 }
 0x579   :  { %v2148_v45 = vpop.xlane.xlu0 %2147 }
 0x57a   :  { %3923 = vrcp.f32 %v2148_v45 }
 0x57b   :  { %v3918_v50 = vpop.eup %3917 }
 0x57c   :  { %v2169_v12 = vmul.f32 %v3918_v50, %v4822_v35 }
 0x57e   :  { %3737 = vmatmul.mubr.msk.f32.vlgmr.msra.gmra.mrb[8].mxu1 %vm1480_vm3, %v2169_v12 }
 0x57f   :  { %v3920_v38 = vpop.eup %3919  ;;  %3745 = vmatpush3.msra.mxu1 %v1396_v33  ;;  %3746 = vmatprep.mubr.msk.f32.mxu1 %vm4294_vm2, %v4293_v47 }
 0x580   :  { %v2171_v51 = vmul.f32 %v3920_v38, %v4828_v43  ;;  %3754 = vmatprep.subr.mxu1 %v4293_v47  ;;  %v3922_v52 = vpop.eup %3921  ;;  %v2151_v43 = vpop.xlane.xlu1 %2150 }
 0x581   :  { %v2170_v53 = vmul.f32 %v3922_v52, %v4830_v49  ;;  %v2157_v49 = vpop.xlane.xlu0 %2156  ;;  %3925 = vrcp.f32 %v2151_v43 }
 0x582   :  { %3747 = vmatmul.mubr.msk.f32.vlgmr.msra.gmra.mrb[10].mxu1 %vm1480_vm3, %v2171_v51 }
 0x583   :  { %3756 = vmatprep.mubr.msk.f32.mxu1 %vm4294_vm2, %v4293_v47  ;;  %3742 = vmatmul.mubr.msk.f32.vlgmr.msra.gmra.mrb[16].mxu0 %vm1480_vm3, %v2170_v53 }
 0x584   :  { %v3924_v35 = vpop.eup %3923  ;;  %3750 = vmatpush3.msra.mxu0 %v1397_v34  ;;  %3751 = vmatprep.mubr.msk.f32.mxu0 %vm4294_vm2, %v4293_v47  ;;  %v1185_v55 = vpop.permute.xlu1 %1184 }
 0x585   :  { %v2172_v54 = vmul.f32 %v3924_v35, %v4840_v57  ;;  %3759 = vmatprep.subr.mxu0 %v4293_v47  ;;  %v2154_v56 = vpop.xlane.xlu0 %2153  ;;  %v1262_v59 = vcombine.low %v4630_v37, %v1185_v55  ;;  %v1263_v61 = vcombine.high %v4630_v37, %v1185_v55 }
 0x586   :  { %3927 = vrcp.f32 %v2154_v56 }
 0x587   :  { %3752 = vmatmul.mubr.msk.f32.vlgmr.msra.gmra.mrb[18].mxu0 %vm1480_vm3, %v2172_v54  ;;  %v1270_v1 = vrot.slane %v1262_v59, %v4669_v60  ;;  %v1277_v4 = vrot.slane %v1263_v61, %v4669_v60  ;;  %3929 = vrcp.f32 %v2157_v49 }
 0x588   :  { %3761 = vmatprep.mubr.msk.f32.mxu0 %vm4294_vm2, %v4293_v47 }
 0x589   :  { %v1179_v48 = vpop.permute.xlu0 %1178 }
 0x58b   :  { %v3926_v24 = vpop.eup %3925 }
 0x58c   :  { %v2173_v44 = vmul.f32 %v3926_v24, %v4846_v62 }
 0x590   :  { %v3928_v29 = vpop.eup %3927 }
 0x591   :  { %v3930_v34 = vpop.eup %3929  ;;  %v2174_v45 = vmul.f32 %v3928_v29, %v4858_v15 }
 0x592   :  { %v2175_v38 = vmul.f32 %v3930_v34, %v4854_v8 }
 0x5af   :  { %v2160_v58 = vpop.xlane.xlu1 %2159 }
 0x5b0   :  { %3931 = vrcp.f32 %v2160_v58 }
 0x5b3   :  { %v1191_v63 = vpop.permute.xlu1 %1190 }
 0x5b4   :  { %v1278_v0 = vcombine.low %v1179_v48, %v1191_v63  ;;  %v1279_v57 = vcombine.high %v1179_v48, %v1191_v63 }
 0x5b6   :  { %v1286_v9 = vrot.slane %v1278_v0, %v4669_v60  ;;  %v1293_v5 = vrot.slane %v1279_v57, %v4669_v60 }
 0x5b8   :  { %v1294_v6 = vcombine.low %v1270_v1, %v1286_v9  ;;  %v1295_v2 = vcombine.high %v1270_v1, %v1286_v9  ;;  %v1310_v10 = vcombine.low %v1277_v4, %v1293_v5  ;;  %v1311_v11 = vcombine.high %v1277_v4, %v1293_v5 }
 0x5ba   :  { %v1302_v37 = vrot.slane %v1294_v6, %v4671_v3  ;;  %v1309_v7 = vrot.slane %v1295_v2, %v4671_v3  ;;  %v1318_v14 = vrot.slane %v1310_v10, %v4671_v3  ;;  %v1325_v13 = vrot.slane %v1311_v11, %v4671_v3  ;;  %v3932_v42 = vpop.eup %3931 }
 0x5bb   :  { %v2176_v51 = vmul.f32 %v3932_v42, %v4878_v39 }
 0x5bc   :  { %v1398_v16 = vcombine.low %v1302_v37, %v1309_v7  ;;  %v3533_v17 = vcombine.high %v1302_v37, %v1309_v7  ;;  %v1414_v18 = vcombine.low %v1318_v14, %v1325_v13  ;;  %v3534_v19 = vcombine.high %v1318_v14, %v1325_v13 }
 0x5be   :  { %v1405_v20 = vrot.slane %v1398_v16, %v4669_v60  ;;  %v1413_v21 = vrot.slane %v3533_v17, %v4669_v60  ;;  %v1421_v22 = vrot.slane %v1414_v18, %v4669_v60  ;;  %v1429_v23 = vrot.slane %v3534_v19, %v4669_v60 }
 0x5c0   :  { %v1430_v25 = vcombine.low %v1405_v20, %v1413_v21  ;;  %v1446_v26 = vcombine.low %v1421_v22, %v1429_v23  ;;  %v1431_v27 = vcombine.high %v1405_v20, %v1413_v21  ;;  %v1447_v28 = vcombine.high %v1421_v22, %v1429_v23 }
 0x5c2   :  { %v1438_v32 = vrot.slane %v1430_v25, %v4671_v3  ;;  %v1454_v33 = vrot.slane %v1446_v26, %v4671_v3  ;;  %v1445_v46 = vrot.slane %v1431_v27, %v4671_v3  ;;  %v1461_v36 = vrot.slane %v1447_v28, %v4671_v3 }
 0x5c4   :  { %v1462_v40 = vcombine.low %v1438_v32, %v1454_v33  ;;  %v1463_v41 = vcombine.high %v1438_v32, %v1454_v33  ;;  %v1464_v50 = vcombine.low %v1445_v46, %v1461_v36  ;;  %v1465_v12 = vcombine.high %v1445_v46, %v1461_v36 }
 0x5c6   :  { %3755 = vmatpush3.msra.mxu1 %v1462_v40  ;;  %3760 = vmatpush3.msra.mxu0 %v1463_v41 }
 0x5c7   :  { %3757 = vmatmul.mubr.msk.f32.vlgmr.msra.gmra.mrb[12].mxu1 %vm1480_vm3, %v2173_v44  ;;  %3762 = vmatmul.mubr.msk.f32.vlgmr.msra.gmra.mrb[20].mxu0 %vm1480_vm3, %v2174_v45 }
 0x5c8   :  { %3764 = vmatprep.subr.mxu1 %v4293_v47  ;;  %3769 = vmatprep.subr.mxu0 %v4293_v47 }
 0x5c9   :  { %3765 = vmatpush3.msra.mxu1 %v1464_v50  ;;  %3770 = vmatpush3.msra.mxu0 %v1465_v12 }
 0x5ca   :  { %3766 = vmatprep.mubr.msk.f32.mxu1 %vm4294_vm2, %v4293_v47  ;;  %3771 = vmatprep.mubr.msk.f32.mxu0 %vm4294_vm2, %v4293_v47 }
 0x5cb   :  { %3767 = vmatmul.mubr.msk.f32.vlgmr.msra.gmra.mrb[14].mxu1 %vm1480_vm3, %v2175_v38  ;;  %3772 = vmatmul.mubr.msk.f32.vlgmr.msra.gmra.mrb[22].mxu0 %vm1480_vm3, %v2176_v51 }
 0x651   :  { %v2246_v62 = vpop.f32.mrb[8].mxu1 }
 0x652   :  { %v3738_v15 = vpop.f32.mrb[9].mxu1 }
 0x655   :  { %v2392_v52 = vpop.f32.mrb[10].mxu1 }
 0x656   :  { %v2761_v53 = vcombine.low %v2246_v62, %v2392_v52  ;;  %v2762_v35 = vcombine.high %v2246_v62, %v2392_v52  ;;  %v3748_v8 = vpop.f32.mrb[11].mxu1  ;;  %v2319_v54 = vpop.f32.mrb[16].mxu0 }
 0x657   :  { %v3743_v39 = vpop.f32.mrb[17].mxu0  ;;  %v3065_v8 = vld [vmem:[%s5076_s11 + $0x8] sm:$0xff] }
 0x658   :  { %v2769_v58 = vrot.slane %v2761_v53, %v4669_v60  ;;  %v2776_v47 = vrot.slane %v2762_v35, %v4669_v60  ;;  %v3064_v35 = vld [vmem:[%s5076_s11] sm:$0xff] }
 0x65a   :  { %v2465_v43 = vpop.f32.mrb[18].mxu0 }
 0x65b   :  { %v2777_v49 = vcombine.low %v2319_v54, %v2465_v43  ;;  %v2778_v55 = vcombine.high %v2319_v54, %v2465_v43  ;;  %v3753_v56 = vpop.f32.mrb[19].mxu0 }
 0x65d   :  { %v2785_v59 = vrot.slane %v2777_v49, %v4669_v60  ;;  %v2792_v61 = vrot.slane %v2778_v55, %v4669_v60  ;;  %v3843_v55 = vpack.c.bf16 %v3065_v8, %v3064_v35  ;;  %v3221_v8 = vld [vmem:[#allocation20 + $0x18] sm:$0xff] }
 0x65f   :  { %v2793_v48 = vcombine.low %v2769_v58, %v2785_v59  ;;  %v2794_v63 = vcombine.high %v2769_v58, %v2785_v59  ;;  %v2809_v0 = vcombine.low %v2776_v47, %v2792_v61  ;;  %v2810_v57 = vcombine.high %v2776_v47, %v2792_v61  ;;  %3844 = vmatprep.subr.bf16.mxu1 %v3843_v55  ;;  %v3066_v61 = vld [vmem:[%s5076_s11 + $0x10] sm:$0xff] }
 0x660   :  { %3846 = vmatpush3.bf16.msra.mxu1 %v3843_v55 }
 0x661   :  { %v2801_v1 = vrot.slane %v2793_v48, %v4671_v3  ;;  %v2808_v4 = vrot.slane %v2794_v63, %v4671_v3  ;;  %v2817_v9 = vrot.slane %v2809_v0, %v4671_v3  ;;  %v2824_v5 = vrot.slane %v2810_v57, %v4671_v3  ;;  %v3067_v48 = vld [vmem:[%s5076_s11 + $0x18] sm:$0xff] }
 0x663   :  { %v2897_v6 = vcombine.low %v2801_v1, %v2808_v4  ;;  %v3561_v2 = vcombine.high %v2801_v1, %v2808_v4  ;;  %v2913_v10 = vcombine.low %v2817_v9, %v2824_v5  ;;  %v3562_v11 = vcombine.high %v2817_v9, %v2824_v5 }
 0x664   :  { %v3847_v4 = vpack.c.bf16 %v3067_v48, %v3066_v61 }
 0x665   :  { %v2904_v37 = vrot.slane %v2897_v6, %v4669_v60  ;;  %v2912_v7 = vrot.slane %v3561_v2, %v4669_v60  ;;  %v2920_v14 = vrot.slane %v2913_v10, %v4669_v60  ;;  %v2928_v13 = vrot.slane %v3562_v11, %v4669_v60 }
 0x666   :  { %3848 = vmatprep.subr.bf16.mxu1 %v3847_v4 }
 0x667   :  { %v2929_v16 = vcombine.low %v2904_v37, %v2912_v7  ;;  %v2945_v17 = vcombine.low %v2920_v14, %v2928_v13  ;;  %v2930_v18 = vcombine.high %v2904_v37, %v2912_v7  ;;  %v2946_v19 = vcombine.high %v2920_v14, %v2928_v13  ;;  %3850 = vmatpush3.bf16.msra.mxu1 %v3847_v4 }
 0x669   :  { %v4947_v20 = vrot.slane %v2929_v16, %v4671_v3  ;;  %v4950_v21 = vrot.slane %v2945_v17, %v4671_v3  ;;  %v2944_v22 = vrot.slane %v2930_v18, %v4671_v3  ;;  %v2960_v23 = vrot.slane %v2946_v19, %v4671_v3 }
 0x66b   :  { %v2962_v24 = vcombine.high %v4947_v20, %v4950_v21  ;;  %v2961_v25 = vcombine.low %v4947_v20, %v4950_v21  ;;  %v2963_v26 = vcombine.low %v2944_v22, %v2960_v23  ;;  %v2964_v27 = vcombine.high %v2944_v22, %v2960_v23 }
 0x66d   :  { %3035 = vrot.lane.b32.xlu0 %v2962_v24, %s4283_s3 }
 0x671   :  { %3043 = vrot.lane.b32.xlu0 %v2963_v26, %s4274_s22 }
 0x675   :  { %3051 = vrot.lane.b32.xlu0 %v2964_v27, %s4297_s2 }
 0x69a   :  { %v2538_v28 = vpop.f32.mrb[12].mxu1  ;;  %v2611_v29 = vpop.f32.mrb[20].mxu0 }
 0x69b   :  { %v3758_v32 = vpop.f32.mrb[13].mxu1  ;;  %v3763_v33 = vpop.f32.mrb[21].mxu0 }
 0x69c   :  { %v3565_v33 = vld [vmem:[#allocation16] ss:$0 sm:$0xff] }
 0x69e   :  { %v2684_v34 = vpop.f32.mrb[14].mxu1  ;;  %v2757_v46 = vpop.f32.mrb[22].mxu0 }
 0x69f   :  { %v2829_v36 = vcombine.low %v2538_v28, %v2684_v34  ;;  %v2830_v40 = vcombine.high %v2538_v28, %v2684_v34  ;;  %v2845_v41 = vcombine.low %v2611_v29, %v2757_v46  ;;  %v2846_v42 = vcombine.high %v2611_v29, %v2757_v46  ;;  %v3768_v44 = vpop.f32.mrb[15].mxu1  ;;  %v3773_v45 = vpop.f32.mrb[23].mxu0 }
 0x6a1   :  { %v2837_v50 = vrot.slane %v2829_v36, %v4669_v60  ;;  %v2844_v12 = vrot.slane %v2830_v40, %v4669_v60  ;;  %v2853_v38 = vrot.slane %v2845_v41, %v4669_v60  ;;  %v2860_v51 = vrot.slane %v2846_v42, %v4669_v60 }
 0x6a3   :  { %v2861_v62 = vcombine.low %v2837_v50, %v2853_v38  ;;  %v2862_v15 = vcombine.high %v2837_v50, %v2853_v38  ;;  %v2877_v52 = vcombine.low %v2844_v12, %v2860_v51  ;;  %v2878_v53 = vcombine.high %v2844_v12, %v2860_v51 }
 0x6a5   :  { %v2869_v54 = vrot.slane %v2861_v62, %v4671_v3  ;;  %v2876_v39 = vrot.slane %v2862_v15, %v4671_v3  ;;  %v2885_v43 = vrot.slane %v2877_v52, %v4671_v3  ;;  %v2892_v49 = vrot.slane %v2878_v53, %v4671_v3  ;;  %v3218_v15 = vld [vmem:[#allocation20] sm:$0xff]  ;;  %v3219_v52 = vld [vmem:[#allocation20 + $0x8] sm:$0xff]  ;;  %v3220_v53 = vld [vmem:[#allocation20 + $0x10] sm:$0xff] }
 0x6a6   :  { %v3851_v35 = vpack.c.bf16 %v3219_v52, %v3218_v15 }
 0x6a7   :  { %v2965_v56 = vcombine.low %v2869_v54, %v2876_v39  ;;  %v3563_v58 = vcombine.high %v2869_v54, %v2876_v39  ;;  %v2981_v47 = vcombine.low %v2885_v43, %v2892_v49  ;;  %v3564_v59 = vcombine.high %v2885_v43, %v2892_v49  ;;  %v3312_v39 = vld [vmem:[%s5082_s17] sm:$0xff]  ;;  %v3313_v43 = vld [vmem:[%s5082_s17 + $0x8] sm:$0xff]  ;;  %v3314_v49 = vld [vmem:[%s5082_s17 + $0x10] sm:$0xff] }
 0x6a8   :  { %v3855_v54 = vpack.c.bf16 %v3221_v8, %v3220_v53  ;;  %3852 = vmatprep.subr.bf16.mxu0 %v3851_v35  ;;  %v3859_v55 = vpack.c.bf16 %v3313_v43, %v3312_v39 }
 0x6a9   :  { %v2972_v63 = vrot.slane %v2965_v56, %v4669_v60  ;;  %v2980_v0 = vrot.slane %v3563_v58, %v4669_v60  ;;  %v2988_v57 = vrot.slane %v2981_v47, %v4669_v60  ;;  %v2996_v1 = vrot.slane %v3564_v59, %v4669_v60  ;;  %3854 = vmatpush3.bf16.msra.mxu0 %v3851_v35  ;;  %v3315_v56 = vld [vmem:[%s5082_s17 + $0x18] sm:$0xff]  ;;  %v3316_v47 = vld [vmem:[%s5082_s17 + $0x20] sm:$0xff]  ;;  %v3317_v59 = vld [vmem:[%s5082_s17 + $0x28] sm:$0xff] }
 0x6aa   :  { %3856 = vmatprep.subr.bf16.mxu0 %v3855_v54  ;;  %v3863_v58 = vpack.c.bf16 %v3315_v56, %v3314_v49  ;;  %3860 = vmatprep.subr.bf16.mxu1 %v3859_v55  ;;  %v3867_v61 = vpack.c.bf16 %v3317_v59, %v3316_v47 }
 0x6ab   :  { %v2997_v9 = vcombine.low %v2972_v63, %v2980_v0  ;;  %v3013_v5 = vcombine.low %v2988_v57, %v2996_v1  ;;  %v2998_v6 = vcombine.high %v2972_v63, %v2980_v0  ;;  %v3014_v2 = vcombine.high %v2988_v57, %v2996_v1 }
 0x6ad   :  { %v3005_v10 = vrot.slane %v2997_v9, %v4671_v3  ;;  %v3021_v11 = vrot.slane %v3013_v5, %v4671_v3  ;;  %v3012_v37 = vrot.slane %v2998_v6, %v4671_v3  ;;  %v3028_v7 = vrot.slane %v3014_v2, %v4671_v3  ;;  %3858 = vmatpush3.bf16.msra.mxu0 %v3855_v54 }
 0x6af   :  { %v3030_v14 = vcombine.high %v3005_v10, %v3021_v11  ;;  %v3029_v13 = vcombine.low %v3005_v10, %v3021_v11  ;;  %v3031_v16 = vcombine.low %v3012_v37, %v3028_v7  ;;  %v3032_v60 = vcombine.high %v3012_v37, %v3028_v7 }
 0x6b1   :  { %3037 = vrot.lane.b32.xlu1 %v3030_v14, %s4283_s3 }
 0x6b5   :  { %3045 = vrot.lane.b32.xlu1 %v3031_v16, %s4274_s22  ;;  %v3568_v16 = vld [vmem:[#allocation17] ss:$0 sm:$0xff] }
 0x6b9   :  { %3053 = vrot.lane.b32.xlu1 %v3032_v60, %s4297_s2 }
 0x6df   :  { %v3036_v17 = vpop.permute.xlu0 %3035 }
 0x6e0   :  { %v3057_v19 = vsel %vm1480_vm3, %v2961_v25, %v3036_v17 }
 0x6e3   :  { %v3044_v18 = vpop.permute.xlu0 %3043 }
 0x6e4   :  { %v3059_v3 = vsel %vm238_vm0, %v3057_v19, %v3044_v18  ;;  %v3569_v18 = vld [vmem:[#allocation19] ss:$0 sm:$0xff] }
 0x6e7   :  { %v3052_v22 = vpop.permute.xlu0 %3051 }
 0x6e8   :  { %v3062_v23 = vsel %vm3061_vm4, %v3059_v3, %v3052_v22 }
 0x6e9   :  { %3782 = vmatprep.mubr.msk.f32.mxu1 %vm336_vm1, %v3062_v23 }
 0x723   :  { %v3038_v24 = vpop.permute.xlu1 %3037 }
 0x724   :  { %v3058_v27 = vsel %vm1480_vm3, %v3029_v13, %v3038_v24 }
 0x727   :  { %v3046_v26 = vpop.permute.xlu1 %3045 }
 0x728   :  { %v3060_v28 = vsel %vm238_vm0, %v3058_v27, %v3046_v26  ;;  %v3318_v27 = vld [vmem:[%s5082_s17 + $0x30] sm:$0xff] }
 0x72b   :  { %v3054_v29 = vpop.permute.xlu1 %3053 }
 0x72c   :  { %v3063_v32 = vsel %vm3061_vm4, %v3060_v28, %v3054_v29  ;;  %v3319_v28 = vld [vmem:[%s5082_s17 + $0x38] sm:$0xff] }
 0x72d   :  { %3783 = vmatmul.mubr.msk.f32.vlgmr.msra.gmra.mrb[16].mxu1 %vm336_vm1, %v3063_v32  ;;  %v3871_v29 = vpack.c.bf16 %v3319_v28, %v3318_v27  ;;  %v3570_v32 = vld [vmem:[#allocation22] ss:$0 sm:$0xff] }
 0x72e   :  { %3862 = vmatpush3.bf16.msra.mxu1 %v3859_v55 }
 0x72f   :  { %3864 = vmatprep.subr.bf16.mxu1 %v3863_v58 }
 0x732   :  { %3866 = vmatpush3.bf16.msra.mxu1 %v3863_v58 }
 0x733   :  { %3868 = vmatprep.subr.bf16.mxu1 %v3867_v61 }
 0x736   :  { %3870 = vmatpush3.bf16.msra.mxu1 %v3867_v61 }
 0x737   :  { %3872 = vmatprep.subr.bf16.mxu1 %v3871_v29 }
 0x73a   :  { %3874 = vmatpush3.bf16.msra.mxu1 %v3871_v29 }
 0x800   :  { %v3784_v20 = vpop.f32.mrb[16].mxu1 }
 0x801   :  { %v3153_v21 = vadd.f32 %v3784_v20, %v3565_v33  ;;  %v3147_v25 = vpop.f32.mrb[17].mxu1 }
 0x802   :  { %v3148_v34 = vadd.f32 %v3565_v33, %v3147_v25 }
 0x803   :  { %v3157_v46 = vadd.f32 %v3153_v21, %v4616_v31 }
 0x804   :  { %v3156_v36 = vadd.f32 %v3148_v34, %v4614_v30 }
 0x805   :  { %v3163_v40 = vsel %vm336_vm1, %v3157_v46, 0.0 }
 0x806   :  { %3164 = vadd.xlane.f32.xlu1 %v3163_v40  ;;  %v3160_v41 = vsel %vm336_vm1, %v3156_v36, 0.0 }
 0x807   :  { %3161 = vadd.xlane.f32.xlu0 %v3160_v41 }
 0x893   :  { %v3165_v42 = vpop.xlane.xlu1 %3164 }
 0x894   :  { %v3168_v44 = vmul.f32 0.03125, %v3165_v42  ;;  %v3162_v45 = vpop.xlane.xlu0 %3161 }
 0x895   :  { %v3167_v50 = vmul.f32 0.03125, %v3162_v45 }
 0x896   :  { %v5005_v12 = vsub.f32 %v3157_v46, %v3168_v44 }
 0x897   :  { %v3169_v38 = vsub.f32 %v3156_v36, %v3167_v50  ;;  %v3573_v36 = vld [vmem:[%s5083_s18] ss:$0 sm:$0xff] }
 0x898   :  { %v3172_v31 = vmul.f32 %v5005_v12, %v5005_v12 }
 0x899   :  { %v3171_v51 = vmul.f32 %v3169_v38, %v3169_v38 }
 0x89a   :  { %v3176_v30 = vsel %vm336_vm1, %v3172_v31, 0.0 }
 0x89b   :  { %v3173_v62 = vsel %vm336_vm1, %v3171_v51, 0.0 }
 0x89c   :  { %3174 = vadd.xlane.f32.xlu0 %v3173_v62 }
 0x8a0   :  { %3177 = vadd.xlane.f32.xlu0 %v3176_v30 }
 0x929   :  { %v3175_v48 = vpop.xlane.xlu0 %3174 }
 0x92a   :  { %v3180_v63 = vmul.f32 0.032258064, %v3175_v48 }
 0x92c   :  { %3933 = vrsqrt.f32 %v3180_v63  ;;  %vm3184_vm5 = vcmp.eq.f32.partialorder %v3180_v63, inf  ;;  %v3187_v9 = vand.u32 2147483648, %v3180_v63  ;;  %vm3186_vm6 = vcmp.eq.f32.partialorder %v3180_v63, 0.0 }
 0x92d   :  { %v3178_v0 = vpop.xlane.xlu0 %3177 }
 0x92e   :  { %v3181_v57 = vmul.f32 0.032258064, %v3178_v0 }
 0x930   :  { %3935 = vrsqrt.f32 %v3181_v57  ;;  %vm3191_vm7 = vcmp.eq.f32.partialorder %v3181_v57, inf  ;;  %v3194_v37 = vand.u32 2147483648, %v3181_v57  ;;  %vm3193_vm8 = vcmp.eq.f32.partialorder %v3181_v57, 0.0 }
 0x936   :  { %v3934_v1 = vpop.eup %3933 }
 0x937   :  { %v3183_v4 = vmul.f32 %v3934_v1, %v3180_v63 }
 0x939   :  { %v3185_v5 = vsel %vm3184_vm5, %v3180_v63, %v3183_v4 }
 0x93a   :  { %v3936_v6 = vpop.eup %3935  ;;  %v3188_v2 = vsel %vm3186_vm6, %v3187_v9, %v3185_v5  ;;  %v3576_v5 = vld [vmem:[%s5109_s16] ss:$0 sm:$0xff] }
 0x93b   :  { %v3196_v10 = vadd.f32 1e-06, %v3188_v2  ;;  %v3190_v11 = vmul.f32 %v3936_v6, %v3181_v57 }
 0x93d   :  { %3937 = vrcp.f32 %v3196_v10  ;;  %v3192_v7 = vsel %vm3191_vm7, %v3181_v57, %v3190_v11  ;;  %v3577_v11 = vld [vmem:[%s5110_s5] ss:$0 sm:$0xff] }
 0x93e   :  { %v3195_v14 = vsel %vm3193_vm8, %v3194_v37, %v3192_v7 }
 0x93f   :  { %v3197_v13 = vadd.f32 1e-06, %v3195_v14 }
 0x941   :  { %3939 = vrcp.f32 %v3197_v13 }
 0x947   :  { %v3938_v60 = vpop.eup %3937 }
 0x948   :  { %v3206_v17 = vmul.f32 %v3938_v60, %v3568_v16 }
 0x94a   :  { %v3208_v19 = vmul.f32 %v3206_v17, %v3169_v38 }
 0x94b   :  { %v3940_v3 = vpop.eup %3939 }
 0x94c   :  { %v3207_v22 = vmul.f32 %v3940_v3, %v3568_v16  ;;  %v3216_v23 = vadd.f32 %v3569_v18, %v3208_v19 }
 0x94e   :  { %v3209_v24 = vmul.f32 %v3207_v22, %v5005_v12  ;;  %3793 = vmatprep.mubr.msk.f32.mxu0 %vm336_vm1, %v3216_v23 }
 0x950   :  { %v3217_v26 = vadd.f32 %v3569_v18, %v3209_v24 }
 0x952   :  { %3794 = vmatmul.mubr.msk.f32.vlgmr.msra.gmra.mrb[24].mxu0 %vm336_vm1, %v3217_v26 }
 0xa25   :  { %v3795_v33 = vpop.f32.mrb[24].mxu0 }
 0xa26   :  { %v3307_v20 = vadd.f32 %v3795_v33, %v3570_v32  ;;  %v3301_v21 = vpop.f32.mrb[25].mxu0 }
 0xa27   :  { %v3302_v25 = vadd.f32 %v3570_v32, %v3301_v21 }
 0xa28   :  { %v3311_v46 = vmax.f32 %v3307_v20, 0.0 }
 0xa29   :  { %v3310_v34 = vmax.f32 %v3302_v25, 0.0 }
 0xa2b   :  { %3812 = vmatprep.mubr.msk.f32.mxu1 %vm3327_vm9, %v3310_v34 }
 0xa2c   :  { %3813 = vmatmul.mubr.msk.f32.vlgmr.msra.gmra.mrb[18].mxu1 %vm3327_vm9, %v3311_v46 }
 0xaff   :  { %v3814_v40 = vpop.f32.mrb[18].mxu1 }
 0xb00   :  { %v3406_v41 = vadd.f32 %v3814_v40, %v3573_v36  ;;  %v3400_v42 = vpop.f32.mrb[19].mxu1 }
 0xb01   :  { %v3401_v44 = vadd.f32 %v3573_v36, %v3400_v42 }
 0xb02   :  { %v3410_v45 = vadd.f32 %v3406_v41, %v3217_v26 }
 0xb03   :  { %v3409_v50 = vadd.f32 %v3401_v44, %v3216_v23 }
 0xb04   :  { %v3416_v12 = vsel %vm336_vm1, %v3410_v45, 0.0 }
 0xb05   :  { %3417 = vadd.xlane.f32.xlu0 %v3416_v12  ;;  %v3413_v38 = vsel %vm336_vm1, %v3409_v50, 0.0 }
 0xb06   :  { %3414 = vadd.xlane.f32.xlu1 %v3413_v38 }
 0xb92   :  { %v3418_v51 = vpop.xlane.xlu0 %3417 }
 0xb93   :  { %v3420_v62 = vmul.f32 0.03125, %v3418_v51  ;;  %v3415_v31 = vpop.xlane.xlu1 %3414 }
 0xb94   :  { %v3419_v30 = vmul.f32 0.03125, %v3415_v31 }
 0xb95   :  { %v3422_v15 = vsub.f32 %v3410_v45, %v3420_v62 }
 0xb96   :  { %v3421_v52 = vsub.f32 %v3409_v50, %v3419_v30 }
 0xb97   :  { %v3424_v53 = vmul.f32 %v3422_v15, %v3422_v15 }
 0xb98   :  { %v3423_v35 = vmul.f32 %v3421_v52, %v3421_v52 }
 0xb99   :  { %v3428_v8 = vsel %vm336_vm1, %v3424_v53, 0.0 }
 0xb9a   :  { %3429 = vadd.xlane.f32.xlu0 %v3428_v8  ;;  %v3425_v54 = vsel %vm336_vm1, %v3423_v35, 0.0 }
 0xb9b   :  { %3426 = vadd.xlane.f32.xlu1 %v3425_v54 }
 0xc27   :  { %v3430_v39 = vpop.xlane.xlu0 %3429 }
 0xc28   :  { %v3432_v43 = vmul.f32 0.032258064, %v3430_v39  ;;  %v3427_v49 = vpop.xlane.xlu1 %3426 }
 0xc29   :  { %v3431_v55 = vmul.f32 0.032258064, %v3427_v49 }
 0xc2a   :  { %3941 = vrsqrt.f32 %v3432_v43  ;;  %vm3442_vm10 = vcmp.eq.f32.partialorder %v3432_v43, inf  ;;  %v3445_v59 = vand.u32 2147483648, %v3432_v43  ;;  %vm3444_vm11 = vcmp.eq.f32.partialorder %v3432_v43, 0.0 }
 0xc2b   :  { %3943 = vrsqrt.f32 %v3431_v55  ;;  %vm3435_vm12 = vcmp.eq.f32.partialorder %v3431_v55, inf  ;;  %v3438_v63 = vand.u32 2147483648, %v3431_v55  ;;  %vm3437_vm13 = vcmp.eq.f32.partialorder %v3431_v55, 0.0 }
 0xc34   :  { %v3942_v56 = vpop.eup %3941 }
 0xc35   :  { %v3944_v58 = vpop.eup %3943  ;;  %v3441_v47 = vmul.f32 %v3942_v56, %v3432_v43 }
 0xc36   :  { %v3434_v61 = vmul.f32 %v3944_v58, %v3431_v55 }
 0xc37   :  { %v3443_v48 = vsel %vm3442_vm10, %v3432_v43, %v3441_v47 }
 0xc38   :  { %v3446_v0 = vsel %vm3444_vm11, %v3445_v59, %v3443_v48  ;;  %v3436_v57 = vsel %vm3435_vm12, %v3431_v55, %v3434_v61 }
 0xc39   :  { %v3448_v1 = vadd.f32 1e-06, %v3446_v0  ;;  %v3439_v4 = vsel %vm3437_vm13, %v3438_v63, %v3436_v57 }
 0xc3a   :  { %v3447_v9 = vadd.f32 1e-06, %v3439_v4 }
 0xc3b   :  { %3945 = vrcp.f32 %v3448_v1 }
 0xc3c   :  { %3947 = vrcp.f32 %v3447_v9 }
 0xc45   :  { %v3946_v6 = vpop.eup %3945 }
 0xc46   :  { %v3948_v2 = vpop.eup %3947  ;;  %v3458_v10 = vmul.f32 %v3946_v6, %v3576_v5 }
 0xc47   :  { %v3457_v37 = vmul.f32 %v3948_v2, %v3576_v5 }
 0xc48   :  { %v3460_v7 = vmul.f32 %v3458_v10, %v3422_v15 }
 0xc49   :  { %v3459_v14 = vmul.f32 %v3457_v37, %v3421_v52 }
 0xc4a   :  { %v3468_v13 = vadd.f32 %v3577_v11, %v3460_v7 }
 0xc4b   :  { %v3467_v16 = vadd.f32 %v3577_v11, %v3459_v14 }
 0xc4c   :  { %v3476_v60 = vsel %vm336_vm1, %v3468_v13, -inf }
 0xc4d   :  { %v3469_v17 = vsel %vm336_vm1, %v3467_v16, -inf  ;;  %v3477_v18 = vrot.slane %v3476_v60, 4 }
 0xc4e   :  { %v3470_v19 = vrot.slane %v3469_v17, 4 }
 0xc4f   :  { %v3478_v3 = vmax.f32 %v3476_v60, %v3477_v18 }
 0xc50   :  { %v3471_v22 = vmax.f32 %v3469_v17, %v3470_v19 }
 0xc51   :  { %v3479_v23 = vrot.slane %v3478_v3, 2 }
 0xc52   :  { %v3472_v24 = vrot.slane %v3471_v22, 2 }
 0xc53   :  { %v3480_v26 = vmax.f32 %v3478_v3, %v3479_v23 }
 0xc54   :  { %v3473_v27 = vmax.f32 %v3471_v22, %v3472_v24 }
 0xc55   :  { %v3481_v28 = vrot.slane %v3480_v26, 1 }
 0xc56   :  { %v3474_v29 = vrot.slane %v3473_v27, 1 }
 0xc57   :  { %v3482_v32 = vmax.f32 %v3480_v26, %v3481_v28 }
 0xc58   :  { %v3475_v33 = vmax.f32 %v3473_v27, %v3474_v29 }
 0xc5a   :  { %v3486_v20 = vsel %vm3485_vm14, %v3482_v32, %v3475_v33 }
 0xc5b   :  { %3489 = vst.msk [vmem:[#allocation23] sm:$0x3] %vm3488_vm15, %v3486_v20 }
 0xc5c   :  { %4246 = shalt.err (!%p4243_p10)
}
 0xc5d   :  { %s5111_s12 = sld [smem:[#allocation40_spill]] }
 0xc63   :  { %s4247_s20 = scalar_lea.hbm %s5111_s12, 32 }
 0xc64   :  { %p4248_p11 = scmp.ne.s32.totalorder %s5111_s12, %s4247_s20  ;;  %p4251_p12 = scmp.lt.u32.totalorder %s4247_s20, %s5111_s12 }
 0xc66   :  { %p4253_p13 = pnand %p4251_p12, %p4248_p11 }
 0xc68   :  { %4256 = shalt.err (!%p4253_p13)
}
 0xc69   :  { %3499 = dma.vmem_to_hbm [thread:$0]  %s3497_s30, 32, %s5111_s12, [#allocation4]  }
 0xc6a   :  { %4271 = dma.done.wait [#allocation4], 32  }
 0xc6b   :  { %4272 = vsyncadd [#allocation4], 4294967264 }
 0xc6c   :  { %3503 = vsyncpa [#allocation3], 1 }
 0xc6d   :  { %3504 = vsyncpa [#allocation6], 1 }
 0xc6e   :  { %3505 = vsyncpa [#allocation9], 1 }
 0xc6f   :  { %3506 = vsyncpa [#allocation12], 1 }
 0xc70   :  { %3507 = vsyncpa [#allocation15], 1 }
 0xc71   :  { %3508 = vsyncpa [#allocation18], 1 }
 0xc72   :  { %3509 = vsyncpa [#allocation21], 1 }
 0xc73   :  { %3510 = vsyncpa [#allocation4], 1 }

</bundles_post_ra>
